<compile_context>
chip_gen: v7x
topology: tpu7x:2x2x1
jax: 0.10.0
libtpu: 0.0.40
codegen_flags: <defaults>
</compile_context>

<pallas_src>
import functools

import jax
import jax.numpy as jnp
from jax.experimental import pallas as pl
from jax.experimental.pallas import tpu as pltpu


def _self_attention_kernel(x_ref, wqkv_ref, bqkv_ref, wdw_ref, bdw_ref,
                           temp_ref, bias_ref, wpo_ref, bpo_ref, y_ref,
                           *, H, W):
    C3, C = wqkv_ref.shape
    HW = H * W

    x = x_ref[0].astype(jnp.float32)                                  # (C, HW)

    # ---- 1) pointwise qkv conv: (3C, C) @ (C, HW) + bias ----
    qkv = jnp.dot(wqkv_ref[...], x,
                  preferred_element_type=jnp.float32) + bqkv_ref[...]

    # ---- 2) 3x3 depthwise conv (zero padding) on the flat (3C, HW) slab.
    # Position p = i*W + j; a (dy, dx) tap reads p + dy*W + dx. Shifts are lane
    # rolls (XLU slot, overlaps with VPU work); image-border taps are masked.
    # The four base border masks are computed ONCE and combined per tap.
    pos = jax.lax.broadcasted_iota(jnp.int32, (C3, HW), 1)
    if (W & (W - 1)) == 0:
        col = jax.lax.bitwise_and(pos, W - 1)
    else:
        col = jax.lax.rem(pos, W)
    has_up = pos >= W                     # row i-1 exists
    has_dn = pos < (H - 1) * W            # row i+1 exists
    has_l = col >= 1                      # col j-1 exists
    has_r = col <= W - 2                  # col j+1 exists
    row_masks = {-1: has_up, 0: None, 1: has_dn}
    col_masks = {-1: has_l, 0: None, 1: has_r}

    wdw = wdw_ref[...]                                                # (3C, 9)
    dw = jnp.zeros((C3, HW), jnp.float32)
    for dy in (-1, 0, 1):
        for dx in (-1, 0, 1):
            s = dy * W + dx
            shifted = qkv if s == 0 else pltpu.roll(qkv, shift=(-s) % HW, axis=1)
            rm, cm = row_masks[dy], col_masks[dx]
            if rm is None:
                valid = cm
            elif cm is None:
                valid = rm
            else:
                valid = jnp.logical_and(rm, cm)
            tap = shifted if valid is None else jnp.where(valid, shifted, 0.0)
            kidx = (dy + 1) * 3 + (dx + 1)
            dw = dw + tap * wdw[:, kidx:kidx + 1]
    dw = dw + bdw_ref[...]

    # ---- 3) transposed (channel) attention, all heads fused ----
    # L2-normalize the q and k slabs for ALL heads in one pass (per-row over HW).
    qk = dw[0:2 * C, :]
    inv_norm = 1.0 / jnp.maximum(
        jnp.sqrt(jnp.sum(qk * qk, axis=-1, keepdims=True)), 1e-12)
    qk = qk * inv_norm
    v = dw[2 * C:3 * C, :]                                            # (C, HW)

    # Full (C, C) gram matrix in one MXU call; cross-head blocks are killed by
    # the additive bias before the softmax (-1e30 -> exp underflows to 0).
    # TODO(synk): for very large num_heads, switch to a batched per-head einsum
    # to avoid the O(C^2) vs O(C^2/num_heads) extra MXU flops.
    att = jax.lax.dot_general(qk[0:C, :], qk[C:2 * C, :],
                              (((1,), (1,)), ((), ())),
                              preferred_element_type=jnp.float32)     # (C, C)
    att = att * temp_ref[...] + bias_ref[...]        # per-row temp + head mask
    att = att - jnp.max(att, axis=-1, keepdims=True)
    e = jnp.exp(att)
    p = e / jnp.sum(e, axis=-1, keepdims=True)       # off-head entries -> 0
    out = jnp.dot(p, v, preferred_element_type=jnp.float32)           # (C, HW)

    # ---- 4) output projection: (C, C) @ (C, HW) + bias ----
    y = jnp.dot(wpo_ref[...], out,
                preferred_element_type=jnp.float32) + bpo_ref[...]
    y_ref[0] = y.astype(y_ref.dtype)


def self_attention(x, w_qkv, b_qkv, w_dw, b_dw, temperature, w_po, b_po,
                   *, num_heads):
    """x: (B, C, H, W). Weights mirror the PyTorch module:
       w_qkv (3C, C), b_qkv (3C,), w_dw (3C, 3, 3), b_dw (3C,),
       temperature (num_heads,), w_po (C, C), b_po (C,)."""
    B, C, H, W = x.shape
    HW = H * W
    C3 = 3 * C
    assert C % num_heads == 0
    ch = C // num_heads
    # TODO(synk): if H*W is not a multiple of 128, pad HW in the wrapper (and
    # mask the padded lanes in the depthwise taps / L2 norms) for lane-dense
    # stores; if C*HW grows past the scoped VMEM budget (v7x: 64 MiB physical),
    # tile HW with a two-pass scheme instead of the full per-batch slab.

    x_flat = x.reshape(B, C, HW)
    w_dw2 = w_dw.reshape(C3, 9)
    b_qkv2 = b_qkv.reshape(C3, 1)
    b_dw2 = b_dw.reshape(C3, 1)
    b_po2 = b_po.reshape(C, 1)

    # Per-query-channel temperature and head-block additive mask, precomputed
    # on the host so the kernel does no per-head bookkeeping.
    temp_full = jnp.repeat(temperature.astype(jnp.float32), ch).reshape(C, 1)
    head_id = jnp.arange(C) // ch
    attn_bias = jnp.where(head_id[:, None] == head_id[None, :],
                          0.0, -1e30).astype(jnp.float32)             # (C, C)

    kernel = functools.partial(_self_attention_kernel, H=H, W=W)

    y_flat = pl.pallas_call(
        kernel,
        out_shape=jax.ShapeDtypeStruct((B, C, HW), x.dtype),
        grid_spec=pltpu.PrefetchScalarGridSpec(
            num_scalar_prefetch=0,
            grid=(B,),
            in_specs=[
                pl.BlockSpec((1, C, HW), lambda b: (b, 0, 0)),
                pl.BlockSpec((C3, C), lambda b: (0, 0)),
                pl.BlockSpec((C3, 1), lambda b: (0, 0)),
                pl.BlockSpec((C3, 9), lambda b: (0, 0)),
                pl.BlockSpec((C3, 1), lambda b: (0, 0)),
                pl.BlockSpec((C, 1), lambda b: (0, 0)),
                pl.BlockSpec((C, C), lambda b: (0, 0)),
                pl.BlockSpec((C, C), lambda b: (0, 0)),
                pl.BlockSpec((C, 1), lambda b: (0, 0)),
            ],
            out_specs=pl.BlockSpec((1, C, HW), lambda b: (b, 0, 0)),
        ),
        compiler_params=pltpu.CompilerParams(
            dimension_semantics=("parallel",)),
    )(x_flat, w_qkv, b_qkv2, w_dw2, b_dw2, temp_full, attn_bias, w_po, b_po2)

    return y_flat.reshape(B, C, H, W)


def init_params(key, dim, num_heads):
    """Deterministic init matching nn.Conv2d defaults (uniform +/- 1/sqrt(fan_in))."""
    C3 = 3 * dim
    keys = jax.random.split(key, 7)
    lim_qkv = 1.0 / jnp.sqrt(dim)     # fan_in = dim * 1 * 1
    lim_dw = 1.0 / 3.0                # fan_in = 1 * 3 * 3 (depthwise)
    lim_po = 1.0 / jnp.sqrt(dim)
    w_qkv = jax.random.uniform(keys[0], (C3, dim), jnp.float32, -lim_qkv, lim_qkv)
    b_qkv = jax.random.uniform(keys[1], (C3,), jnp.float32, -lim_qkv, lim_qkv)
    w_dw = jax.random.uniform(keys[2], (C3, 3, 3), jnp.float32, -lim_dw, lim_dw)
    b_dw = jax.random.uniform(keys[3], (C3,), jnp.float32, -lim_dw, lim_dw)
    temperature = jax.random.uniform(keys[4], (num_heads,), jnp.float32, 0.5, 1.5)
    w_po = jax.random.uniform(keys[5], (dim, dim), jnp.float32, -lim_po, lim_po)
    b_po = jax.random.uniform(keys[6], (dim,), jnp.float32, -lim_po, lim_po)
    return w_qkv, b_qkv, w_dw, b_dw, temperature, w_po, b_po


def self_attention_ref(x, w_qkv, b_qkv, w_dw, b_dw, temperature, w_po, b_po,
                       *, num_heads):
    """Pure-JAX reference mirroring the PyTorch forward."""
    B, C, H, W = x.shape
    HW = H * W
    hp = jax.lax.Precision.HIGHEST
    qkv = jnp.einsum('oc,bchw->bohw', w_qkv, x, precision=hp) \
        + b_qkv[None, :, None, None]
    qkv = jax.lax.conv_general_dilated(
        qkv, w_dw.reshape(3 * C, 1, 3, 3),
        window_strides=(1, 1), padding=((1, 1), (1, 1)),
        dimension_numbers=('NCHW', 'OIHW', 'NCHW'),
        feature_group_count=3 * C, precision=hp) + b_dw[None, :, None, None]
    q, k, v = jnp.split(qkv, 3, axis=1)
    ch = C // num_heads

    def rearr(t):
        return t.reshape(B, num_heads, ch, HW)

    q, k, v = rearr(q), rearr(k), rearr(v)

    def l2norm(t):
        n = jnp.sqrt(jnp.sum(t * t, axis=-1, keepdims=True))
        return t / jnp.maximum(n, 1e-12)

    q = l2norm(q)
    k = l2norm(k)
    attn = jnp.einsum('bhcd,bhed->bhce', q, k, precision=hp) \
        * temperature.reshape(1, num_heads, 1, 1)
    attn = jax.nn.softmax(attn, axis=-1)
    out = jnp.einsum('bhce,bhed->bhcd', attn, v, precision=hp)
    out = out.reshape(B, C, H, W)
    out = jnp.einsum('oc,bchw->bohw', w_po, out, precision=hp) \
        + b_po[None, :, None, None]
    return out


if __name__ == "__main__":
    key = jax.random.PRNGKey(0)
    kx, kp = jax.random.split(key)

    B, dim, H, W = 2, 16, 16, 16
    num_heads = 2

    x = jax.random.normal(kx, (B, dim, H, W), jnp.float32)
    params = init_params(kp, dim, num_heads)

    out = self_attention(x, *params, num_heads=num_heads)
    out = jax.block_until_ready(out)

    ref = self_attention_ref(x, *params, num_heads=num_heads)
    assert out.shape == x.shape
    max_err = float(jnp.max(jnp.abs(out - ref)))
    assert jnp.allclose(out, ref, atol=1e-3, rtol=1e-3), (
        f"mismatch vs reference (max abs err {max_err})")

    print("KERNEL_OK")
</pallas_src>

<mosaic_0001>
module attributes {stable_mosaic.version = 11 : i64} {
  func.func @_self_attention_kernel(%arg0: i32, %arg1: memref<1x16x256xf32, #tpu.memory_space<vmem>>, %arg2: memref<48x16xf32, #tpu.memory_space<vmem>>, %arg3: memref<48x1xf32, #tpu.memory_space<vmem>>, %arg4: memref<48x9xf32, #tpu.memory_space<vmem>>, %arg5: memref<48x1xf32, #tpu.memory_space<vmem>>, %arg6: memref<16x1xf32, #tpu.memory_space<vmem>>, %arg7: memref<16x16xf32, #tpu.memory_space<vmem>>, %arg8: memref<16x16xf32, #tpu.memory_space<vmem>>, %arg9: memref<16x1xf32, #tpu.memory_space<vmem>>, %arg10: memref<1x16x256xf32, #tpu.memory_space<vmem>>) attributes {dimension_semantics = [#tpu.dimension_semantics<parallel>], iteration_bounds = array<i64: 2>, scalar_prefetch = 0 : i64, scratch_operands = 0 : i64, tpu.core_type = #tpu.core_type<tc>, window_params = [{transform_indices = @transform_0, window_bounds = array<i64: 1, 16, 256>}, {pipeline_mode = #tpu.pipeline_mode<synchronous>, transform_indices = @transform_1, window_bounds = array<i64: 48, 16>}, {pipeline_mode = #tpu.pipeline_mode<synchronous>, transform_indices = @transform_2, window_bounds = array<i64: 48, 1>}, {pipeline_mode = #tpu.pipeline_mode<synchronous>, transform_indices = @transform_3, window_bounds = array<i64: 48, 9>}, {pipeline_mode = #tpu.pipeline_mode<synchronous>, transform_indices = @transform_4, window_bounds = array<i64: 48, 1>}, {pipeline_mode = #tpu.pipeline_mode<synchronous>, transform_indices = @transform_5, window_bounds = array<i64: 16, 1>}, {pipeline_mode = #tpu.pipeline_mode<synchronous>, transform_indices = @transform_6, window_bounds = array<i64: 16, 16>}, {pipeline_mode = #tpu.pipeline_mode<synchronous>, transform_indices = @transform_7, window_bounds = array<i64: 16, 16>}, {pipeline_mode = #tpu.pipeline_mode<synchronous>, transform_indices = @transform_8, window_bounds = array<i64: 16, 1>}, {transform_indices = @transform_9, window_bounds = array<i64: 1, 16, 256>}]} {
    %c0 = arith.constant 0 : index
    %c0_0 = arith.constant 0 : index
    %c0_1 = arith.constant 0 : index
    %0 = vector.load %arg1[%c0, %c0_0, %c0_1] : memref<1x16x256xf32, #tpu.memory_space<vmem>>, vector<1x16x256xf32>
    %1 = vector.shape_cast %0 : vector<1x16x256xf32> to vector<16x256xf32>
    %c0_2 = arith.constant 0 : index
    %c0_3 = arith.constant 0 : index
    %2 = vector.load %arg2[%c0_2, %c0_3] : memref<48x16xf32, #tpu.memory_space<vmem>>, vector<48x16xf32>
    %cst = arith.constant dense<0.000000e+00> : vector<48x256xf32>
    %3 = tpu.matmul %2, %1, %cst {dimension_numbers = #tpu.dot_dimension_numbers<[1], [0], [0], [1], [0, 0, 1, 1], [], []>} : vector<48x16xf32>, vector<16x256xf32>, vector<48x256xf32> -> vector<48x256xf32>
    %c0_4 = arith.constant 0 : index
    %c0_5 = arith.constant 0 : index
    %4 = vector.load %arg3[%c0_4, %c0_5] : memref<48x1xf32, #tpu.memory_space<vmem>>, vector<48x1xf32>
    %5 = vector.broadcast %4 : vector<48x1xf32> to vector<48x256xf32>
    %6 = arith.addf %3, %5 : vector<48x256xf32>
    %7 = tpu.iota {dimensions = array<i32: 1>} : vector<48x256xi32>
    %c15_i32 = arith.constant 15 : i32
    %8 = vector.broadcast %c15_i32 : i32 to vector<48x256xi32>
    %9 = arith.andi %7, %8 : vector<48x256xi32>
    %c16_i32 = arith.constant 16 : i32
    %10 = vector.broadcast %c16_i32 : i32 to vector<48x256xi32>
    %11 = arith.cmpi sge, %7, %10 : vector<48x256xi32>
    %c240_i32 = arith.constant 240 : i32
    %12 = vector.broadcast %c240_i32 : i32 to vector<48x256xi32>
    %13 = arith.cmpi slt, %7, %12 : vector<48x256xi32>
    %c1_i32 = arith.constant 1 : i32
    %14 = vector.broadcast %c1_i32 : i32 to vector<48x256xi32>
    %15 = arith.cmpi sge, %9, %14 : vector<48x256xi32>
    %c14_i32 = arith.constant 14 : i32
    %16 = vector.broadcast %c14_i32 : i32 to vector<48x256xi32>
    %17 = arith.cmpi sle, %9, %16 : vector<48x256xi32>
    %c0_6 = arith.constant 0 : index
    %c0_7 = arith.constant 0 : index
    %18 = vector.load %arg4[%c0_6, %c0_7] : memref<48x9xf32, #tpu.memory_space<vmem>>, vector<48x9xf32>
    %cst_8 = arith.constant 0.000000e+00 : f32
    %19 = vector.broadcast %cst_8 : f32 to vector<48x256xf32>
    %c17_i32 = arith.constant 17 : i32
    %20 = tpu.dynamic_rotate %6 by %c17_i32 dim 1 : vector<48x256xf32>, i32 -> vector<48x256xf32>
    %21 = arith.andi %11, %15 : vector<48x256xi1>
    %cst_9 = arith.constant 0.000000e+00 : f32
    %22 = vector.broadcast %cst_9 : f32 to vector<48x256xf32>
    %23 = arith.select %21, %20, %22 : vector<48x256xi1>, vector<48x256xf32>
    %24 = vector.extract_strided_slice %18 {offsets = [0, 0], sizes = [48, 1], strides = [1, 1]} : vector<48x9xf32> to vector<48x1xf32>
    %25 = vector.broadcast %24 : vector<48x1xf32> to vector<48x256xf32>
    %26 = arith.mulf %23, %25 : vector<48x256xf32>
    %27 = arith.addf %19, %26 : vector<48x256xf32>
    %c16_i32_10 = arith.constant 16 : i32
    %28 = tpu.dynamic_rotate %6 by %c16_i32_10 dim 1 : vector<48x256xf32>, i32 -> vector<48x256xf32>
    %cst_11 = arith.constant 0.000000e+00 : f32
    %29 = vector.broadcast %cst_11 : f32 to vector<48x256xf32>
    %30 = arith.select %11, %28, %29 : vector<48x256xi1>, vector<48x256xf32>
    %31 = vector.extract_strided_slice %18 {offsets = [0, 1], sizes = [48, 1], strides = [1, 1]} : vector<48x9xf32> to vector<48x1xf32>
    %32 = vector.broadcast %31 : vector<48x1xf32> to vector<48x256xf32>
    %33 = arith.mulf %30, %32 : vector<48x256xf32>
    %34 = arith.addf %27, %33 : vector<48x256xf32>
    %c15_i32_12 = arith.constant 15 : i32
    %35 = tpu.dynamic_rotate %6 by %c15_i32_12 dim 1 : vector<48x256xf32>, i32 -> vector<48x256xf32>
    %36 = arith.andi %11, %17 : vector<48x256xi1>
    %cst_13 = arith.constant 0.000000e+00 : f32
    %37 = vector.broadcast %cst_13 : f32 to vector<48x256xf32>
    %38 = arith.select %36, %35, %37 : vector<48x256xi1>, vector<48x256xf32>
    %39 = vector.extract_strided_slice %18 {offsets = [0, 2], sizes = [48, 1], strides = [1, 1]} : vector<48x9xf32> to vector<48x1xf32>
    %40 = vector.broadcast %39 : vector<48x1xf32> to vector<48x256xf32>
    %41 = arith.mulf %38, %40 : vector<48x256xf32>
    %42 = arith.addf %34, %41 : vector<48x256xf32>
    %c1_i32_14 = arith.constant 1 : i32
    %43 = tpu.dynamic_rotate %6 by %c1_i32_14 dim 1 : vector<48x256xf32>, i32 -> vector<48x256xf32>
    %cst_15 = arith.constant 0.000000e+00 : f32
    %44 = vector.broadcast %cst_15 : f32 to vector<48x256xf32>
    %45 = arith.select %15, %43, %44 : vector<48x256xi1>, vector<48x256xf32>
    %46 = vector.extract_strided_slice %18 {offsets = [0, 3], sizes = [48, 1], strides = [1, 1]} : vector<48x9xf32> to vector<48x1xf32>
    %47 = vector.broadcast %46 : vector<48x1xf32> to vector<48x256xf32>
    %48 = arith.mulf %45, %47 : vector<48x256xf32>
    %49 = arith.addf %42, %48 : vector<48x256xf32>
    %50 = vector.extract_strided_slice %18 {offsets = [0, 4], sizes = [48, 1], strides = [1, 1]} : vector<48x9xf32> to vector<48x1xf32>
    %51 = vector.broadcast %50 : vector<48x1xf32> to vector<48x256xf32>
    %52 = arith.mulf %6, %51 : vector<48x256xf32>
    %53 = arith.addf %49, %52 : vector<48x256xf32>
    %c255_i32 = arith.constant 255 : i32
    %54 = tpu.dynamic_rotate %6 by %c255_i32 dim 1 : vector<48x256xf32>, i32 -> vector<48x256xf32>
    %cst_16 = arith.constant 0.000000e+00 : f32
    %55 = vector.broadcast %cst_16 : f32 to vector<48x256xf32>
    %56 = arith.select %17, %54, %55 : vector<48x256xi1>, vector<48x256xf32>
    %57 = vector.extract_strided_slice %18 {offsets = [0, 5], sizes = [48, 1], strides = [1, 1]} : vector<48x9xf32> to vector<48x1xf32>
    %58 = vector.broadcast %57 : vector<48x1xf32> to vector<48x256xf32>
    %59 = arith.mulf %56, %58 : vector<48x256xf32>
    %60 = arith.addf %53, %59 : vector<48x256xf32>
    %c241_i32 = arith.constant 241 : i32
    %61 = tpu.dynamic_rotate %6 by %c241_i32 dim 1 : vector<48x256xf32>, i32 -> vector<48x256xf32>
    %62 = arith.andi %13, %15 : vector<48x256xi1>
    %cst_17 = arith.constant 0.000000e+00 : f32
    %63 = vector.broadcast %cst_17 : f32 to vector<48x256xf32>
    %64 = arith.select %62, %61, %63 : vector<48x256xi1>, vector<48x256xf32>
    %65 = vector.extract_strided_slice %18 {offsets = [0, 6], sizes = [48, 1], strides = [1, 1]} : vector<48x9xf32> to vector<48x1xf32>
    %66 = vector.broadcast %65 : vector<48x1xf32> to vector<48x256xf32>
    %67 = arith.mulf %64, %66 : vector<48x256xf32>
    %68 = arith.addf %60, %67 : vector<48x256xf32>
    %c240_i32_18 = arith.constant 240 : i32
    %69 = tpu.dynamic_rotate %6 by %c240_i32_18 dim 1 : vector<48x256xf32>, i32 -> vector<48x256xf32>
    %cst_19 = arith.constant 0.000000e+00 : f32
    %70 = vector.broadcast %cst_19 : f32 to vector<48x256xf32>
    %71 = arith.select %13, %69, %70 : vector<48x256xi1>, vector<48x256xf32>
    %72 = vector.extract_strided_slice %18 {offsets = [0, 7], sizes = [48, 1], strides = [1, 1]} : vector<48x9xf32> to vector<48x1xf32>
    %73 = vector.broadcast %72 : vector<48x1xf32> to vector<48x256xf32>
    %74 = arith.mulf %71, %73 : vector<48x256xf32>
    %75 = arith.addf %68, %74 : vector<48x256xf32>
    %c239_i32 = arith.constant 239 : i32
    %76 = tpu.dynamic_rotate %6 by %c239_i32 dim 1 : vector<48x256xf32>, i32 -> vector<48x256xf32>
    %77 = arith.andi %13, %17 : vector<48x256xi1>
    %cst_20 = arith.constant 0.000000e+00 : f32
    %78 = vector.broadcast %cst_20 : f32 to vector<48x256xf32>
    %79 = arith.select %77, %76, %78 : vector<48x256xi1>, vector<48x256xf32>
    %80 = vector.extract_strided_slice %18 {offsets = [0, 8], sizes = [48, 1], strides = [1, 1]} : vector<48x9xf32> to vector<48x1xf32>
    %81 = vector.broadcast %80 : vector<48x1xf32> to vector<48x256xf32>
    %82 = arith.mulf %79, %81 : vector<48x256xf32>
    %83 = arith.addf %75, %82 : vector<48x256xf32>
    %c0_21 = arith.constant 0 : index
    %c0_22 = arith.constant 0 : index
    %84 = vector.load %arg5[%c0_21, %c0_22] : memref<48x1xf32, #tpu.memory_space<vmem>>, vector<48x1xf32>
    %85 = vector.broadcast %84 : vector<48x1xf32> to vector<48x256xf32>
    %86 = arith.addf %83, %85 : vector<48x256xf32>
    %87 = vector.extract_strided_slice %86 {offsets = [0, 0], sizes = [32, 256], strides = [1, 1]} : vector<48x256xf32> to vector<32x256xf32>
    %88 = arith.mulf %87, %87 : vector<32x256xf32>
    %cst_23 = arith.constant dense<0.000000e+00> : vector<32xf32>
    %89 = vector.multi_reduction <add>, %88, %cst_23 [1] : vector<32x256xf32> to vector<32xf32>
    %90 = vector.shape_cast %89 : vector<32xf32> to vector<32x1xf32>
    %91 = math.sqrt %90 : vector<32x1xf32>
    %cst_24 = arith.constant 9.99999996E-13 : f32
    %92 = vector.broadcast %cst_24 : f32 to vector<32x1xf32>
    %93 = arith.maximumf %91, %92 : vector<32x1xf32>
    %cst_25 = arith.constant 1.000000e+00 : f32
    %94 = vector.broadcast %cst_25 : f32 to vector<32x1xf32>
    %95 = arith.divf %94, %93 : vector<32x1xf32>
    %96 = vector.broadcast %95 : vector<32x1xf32> to vector<32x256xf32>
    %97 = arith.mulf %87, %96 : vector<32x256xf32>
    %98 = vector.extract_strided_slice %86 {offsets = [32, 0], sizes = [16, 256], strides = [1, 1]} : vector<48x256xf32> to vector<16x256xf32>
    %99 = vector.extract_strided_slice %97 {offsets = [0, 0], sizes = [16, 256], strides = [1, 1]} : vector<32x256xf32> to vector<16x256xf32>
    %100 = vector.extract_strided_slice %97 {offsets = [16, 0], sizes = [16, 256], strides = [1, 1]} : vector<32x256xf32> to vector<16x256xf32>
    %cst_26 = arith.constant dense<0.000000e+00> : vector<16x16xf32>
    %101 = tpu.matmul %99, %100, %cst_26 {dimension_numbers = #tpu.dot_dimension_numbers<[1], [1], [0], [0], [0, 0, 1, 0], [], []>} : vector<16x256xf32>, vector<16x256xf32>, vector<16x16xf32> -> vector<16x16xf32>
    %c0_27 = arith.constant 0 : index
    %c0_28 = arith.constant 0 : index
    %102 = vector.load %arg6[%c0_27, %c0_28] : memref<16x1xf32, #tpu.memory_space<vmem>>, vector<16x1xf32>
    %103 = vector.broadcast %102 : vector<16x1xf32> to vector<16x16xf32>
    %104 = arith.mulf %101, %103 : vector<16x16xf32>
    %c0_29 = arith.constant 0 : index
    %c0_30 = arith.constant 0 : index
    %105 = vector.load %arg7[%c0_29, %c0_30] : memref<16x16xf32, #tpu.memory_space<vmem>>, vector<16x16xf32>
    %106 = arith.addf %104, %105 : vector<16x16xf32>
    %cst_31 = arith.constant dense<0xFF800000> : vector<16xf32>
    %107 = vector.multi_reduction <maximumf>, %106, %cst_31 [1] : vector<16x16xf32> to vector<16xf32>
    %108 = vector.shape_cast %107 : vector<16xf32> to vector<16x1xf32>
    %109 = vector.broadcast %108 : vector<16x1xf32> to vector<16x16xf32>
    %110 = arith.subf %106, %109 : vector<16x16xf32>
    %111 = math.exp %110 : vector<16x16xf32>
    %cst_32 = arith.constant dense<0.000000e+00> : vector<16xf32>
    %112 = vector.multi_reduction <add>, %111, %cst_32 [1] : vector<16x16xf32> to vector<16xf32>
    %113 = vector.shape_cast %112 : vector<16xf32> to vector<16x1xf32>
    %114 = vector.broadcast %113 : vector<16x1xf32> to vector<16x16xf32>
    %115 = arith.divf %111, %114 : vector<16x16xf32>
    %cst_33 = arith.constant dense<0.000000e+00> : vector<16x256xf32>
    %116 = tpu.matmul %115, %98, %cst_33 {dimension_numbers = #tpu.dot_dimension_numbers<[1], [0], [0], [1], [0, 0, 1, 1], [], []>} : vector<16x16xf32>, vector<16x256xf32>, vector<16x256xf32> -> vector<16x256xf32>
    %c0_34 = arith.constant 0 : index
    %c0_35 = arith.constant 0 : index
    %117 = vector.load %arg8[%c0_34, %c0_35] : memref<16x16xf32, #tpu.memory_space<vmem>>, vector<16x16xf32>
    %cst_36 = arith.constant dense<0.000000e+00> : vector<16x256xf32>
    %118 = tpu.matmul %117, %116, %cst_36 {dimension_numbers = #tpu.dot_dimension_numbers<[1], [0], [0], [1], [0, 0, 1, 1], [], []>} : vector<16x16xf32>, vector<16x256xf32>, vector<16x256xf32> -> vector<16x256xf32>
    %c0_37 = arith.constant 0 : index
    %c0_38 = arith.constant 0 : index
    %119 = vector.load %arg9[%c0_37, %c0_38] : memref<16x1xf32, #tpu.memory_space<vmem>>, vector<16x1xf32>
    %120 = vector.broadcast %119 : vector<16x1xf32> to vector<16x256xf32>
    %121 = arith.addf %118, %120 : vector<16x256xf32>
    %c0_39 = arith.constant 0 : index
    %c0_40 = arith.constant 0 : index
    %c0_41 = arith.constant 0 : index
    %122 = vector.load %arg10[%c0_39, %c0_40, %c0_41] : memref<1x16x256xf32, #tpu.memory_space<vmem>>, vector<1x16x256xf32>
    %123 = vector.shape_cast %122 : vector<1x16x256xf32> to vector<16x256xf32>
    %124 = vector.shape_cast %121 : vector<16x256xf32> to vector<1x16x256xf32>
    tpu.vector_store %arg10[%c0_39, %c0_40, %c0_41], %124 {strides = array<i32>} : memref<1x16x256xf32, #tpu.memory_space<vmem>>, vector<1x16x256xf32>,
    return
  }
  func.func @transform_0(%arg0: i32) -> (i32, i32, i32) {
    %c0_i32 = arith.constant 0 : i32
    %c0_i32_0 = arith.constant 0 : i32
    %c0_i32_1 = arith.constant 0 : i32
    return %arg0, %c0_i32, %c0_i32_0 : i32, i32, i32
  }
  func.func @transform_1(%arg0: i32) -> (i32, i32) {
    %c0_i32 = arith.constant 0 : i32
    %c0_i32_0 = arith.constant 0 : i32
    %c0_i32_1 = arith.constant 0 : i32
    return %c0_i32, %c0_i32_0 : i32, i32
  }
  func.func @transform_2(%arg0: i32) -> (i32, i32) {
    %c0_i32 = arith.constant 0 : i32
    %c0_i32_0 = arith.constant 0 : i32
    %c0_i32_1 = arith.constant 0 : i32
    return %c0_i32, %c0_i32_0 : i32, i32
  }
  func.func @transform_3(%arg0: i32) -> (i32, i32) {
    %c0_i32 = arith.constant 0 : i32
    %c0_i32_0 = arith.constant 0 : i32
    %c0_i32_1 = arith.constant 0 : i32
    return %c0_i32, %c0_i32_0 : i32, i32
  }
  func.func @transform_4(%arg0: i32) -> (i32, i32) {
    %c0_i32 = arith.constant 0 : i32
    %c0_i32_0 = arith.constant 0 : i32
    %c0_i32_1 = arith.constant 0 : i32
    return %c0_i32, %c0_i32_0 : i32, i32
  }
  func.func @transform_5(%arg0: i32) -> (i32, i32) {
    %c0_i32 = arith.constant 0 : i32
    %c0_i32_0 = arith.constant 0 : i32
    %c0_i32_1 = arith.constant 0 : i32
    return %c0_i32, %c0_i32_0 : i32, i32
  }
  func.func @transform_6(%arg0: i32) -> (i32, i32) {
    %c0_i32 = arith.constant 0 : i32
    %c0_i32_0 = arith.constant 0 : i32
    %c0_i32_1 = arith.constant 0 : i32
    return %c0_i32, %c0_i32_0 : i32, i32
  }
  func.func @transform_7(%arg0: i32) -> (i32, i32) {
    %c0_i32 = arith.constant 0 : i32
    %c0_i32_0 = arith.constant 0 : i32
    %c0_i32_1 = arith.constant 0 : i32
    return %c0_i32, %c0_i32_0 : i32, i32
  }
  func.func @transform_8(%arg0: i32) -> (i32, i32) {
    %c0_i32 = arith.constant 0 : i32
    %c0_i32_0 = arith.constant 0 : i32
    %c0_i32_1 = arith.constant 0 : i32
    return %c0_i32, %c0_i32_0 : i32, i32
  }
  func.func @transform_9(%arg0: i32) -> (i32, i32, i32) {
    %c0_i32 = arith.constant 0 : i32
    %c0_i32_0 = arith.constant 0 : i32
    %c0_i32_1 = arith.constant 0 : i32
    return %arg0, %c0_i32, %c0_i32_0 : i32, i32, i32
  }
}

</mosaic_0001>

<bundles_post_ra>
// kernel: tpu_custom_call.1
= control target key start
LH: loop header
LB: loop body
LE: loop exit
PB: predicated region body
PF: predicated region fallthrough
CT: control target
= control target key end

     0   :  { %14 = vsyncpa [#allocation3], 0  ;;  %s3571_s0 = inlined_call_operand.vmem [shape: f32[2,16,256], index: 0, kind: input, shape index: {}]   ;;  %s3572_s1 = inlined_call_operand.vmem [shape: f32[48,16], index: 1, kind: input, shape index: {}]   ;;  %s3573_s2 = inlined_call_operand.vmem [shape: f32[48,1], index: 2, kind: input, shape index: {}]   ;;  %s3574_s3 = inlined_call_operand.vmem [shape: f32[48,9], index: 3, kind: input, shape index: {}]   ;;  %s3575_s4 = inlined_call_operand.vmem [shape: f32[48,1], index: 4, kind: input, shape index: {}]   ;;  %s3576_s5 = inlined_call_operand.vmem [shape: f32[16,1], index: 5, kind: input, shape index: {}]   ;;  %s3577_s6 = inlined_call_operand.vmem [shape: f32[16,16], index: 6, kind: input, shape index: {}]   ;;  %s3578_s7 = inlined_call_operand.vmem [shape: f32[16,16], index: 7, kind: input, shape index: {}]   ;;  %s3579_s8 = inlined_call_operand.vmem [shape: f32[16,1], index: 8, kind: input, shape index: {}]   ;;  %s3580_s9 = inlined_call_operand.hbm [shape: f32[2,16,256], index: 9, kind: output, shape index: {}]  }
   0x1   :  { %16 = vsyncpa [#allocation3 + $0x1], 0  ;;  %s2145_s30 = smov 0   ;;  %s2147_s10 = smov 0  }
   0x2   :  { %s2149_s11 = smov 0   ;;  %s2151_s12 = smov 0  }
   0x3 LB: > { %s2166_s13 = sadd.s32 4294967295, %s2073_s12   ;;  %s1845_s14 = sadd.s32 4294967294, %s2073_s12   ;;  %s2073_s12 = sphi %s2151_s12, %s3794_s12   ;;  %s2069_s11 = sphi %s2149_s11, %s3793_s11   ;;  %s2065_s10 = sphi %s2147_s10, %s3792_s10   ;;  %s2061_s30 = sphi %s2145_s30, %s3791_s30  }
   0x4   : > { %s2170_s15 = sadd.s32 1, %s2073_s12   ;;  %s223_s16 = sadd.s32 1, %s2069_s11 }
   0x5   : > { %s220_s17 = ssub.s32 %s2073_s12, %s2170_s15  ;;  %p233_p0 = scmp.ne.s32.totalorder %s2069_s11, %s2065_s10 }
   0x6   : > { %p221_p1 = scmp.eq.s32.totalorder %s220_s17, 0  ;;  %p234_p2 = scmp.eq.s32.totalorder %s2166_s13, 1 }
   0x7   : > { %p239_p3 = scmp.ne.s32.totalorder %s2065_s10, %s2061_s30  ;;  %p240_p4 = scmp.eq.s32.totalorder %s1845_s14, 1 }
   0x8   : > { %s2181_s18 = scalar_select %p221_p1, %s2069_s11, %s223_s16  }
   0x9   : > { %p2183_p5 = por %p234_p2, %p233_p0  ;;  %p2187_p6 = por %p240_p4, %p239_p3 }
   0xa   : > { %p1848_p7 = scmp.ge.s32.totalorder %s2073_s12, 1  ;;  %p290_p8 = scmp.lt.s32.totalorder %s2073_s12, 3 }
   0xc   : > { %p291_p9 = pnand %p1848_p7, %p290_p8 }
   0xe   : > { %294 = sbr.rel (%p291_p9) target bundleno = 1693 (0x69d), region = 56 }
  0x15   : > { %v341_v0 = vld [vmem:[%s3573_s2] sm:$0xff]  ;;  %p326_p10 = scmp.lt.s32.totalorder %s2166_s13, 1  ;;  %v3581_v1 = vmov 0   ;;  %v3585_v2 = vmov 0.0   ;;  %v2203_v3 = vld [vmem:[%s3574_s3 + $0x18] sm:$0xff]  ;;  %v3591_v4 = vmov 2  }
  0x16   : > { %1943 = vset.pattern.permute.xlu1 %v3581_v1  ;;  %460 = vmatprep.mubr.f32.mxu0 %v3585_v2  ;;  %v342_v5 = vld [vmem:[%s3573_s2 + $0x8] sm:$0xff]  ;;  %v2216_v11 = vld [vmem:[%s3574_s3 + $0x10] sm:$0xff]  ;;  %v3592_v12 = vmov 4   ;;  %v335_v14 = vld [vmem:[%s3572_s1] sm:$0xff]  ;;  %vm3629_vm0 = vcmask 130048   ;;  %v3584_v15 = vmov 6  }
  0x17   : > { %349 = vperm.xlu1 %1943, %v341_v0   ;;  %s327_s23 = scalar_select %p326_p10, %s2166_s13, 1  ;;  %1946 = vset.pattern.permute.xlu0 %v3591_v4  ;;  %v3594_v16 = vmov 1   ;;  %v336_v17 = vld [vmem:[%s3572_s1 + $0x8] sm:$0xff]  ;;  %v337_v18 = vld [vmem:[%s3572_s1 + $0x10] sm:$0xff]  ;;  %v338_v20 = vld [vmem:[%s3572_s1 + $0x18] sm:$0xff]  ;;  %v3590_v21 = vmov 3  }
  0x18   : > { %782 = vperm.xlu0 %1946, %v2203_v3   ;;  %v2244_v19 = vld [vmem:[%s3574_s3 + $0x8] sm:$0xff]  ;;  %v3589_v22 = vmov 5   ;;  %v3583_v23 = vmov 7   ;;  %v510_v24 = vld [vmem:[%s3574_s3] sm:$0xff]  ;;  %v3587_v25 = vmov 8   ;;  %v343_v26 = vld [vmem:[%s3573_s2 + $0x10] sm:$0xff] }
  0x19   : > { %s1867_s28 = sshll.u32 %s327_s23, 5  ;;  %v344_v27 = vld [vmem:[%s3573_s2 + $0x18] sm:$0xff]  ;;  %v1356_v28 = vld [vmem:[%s3575_s4 + $0x10] sm:$0xff]  ;;  %s2086_s29 = smov 17  }
  0x1a   : > { %s330_s16 = scalar_lea.vmem %s3571_s0, %s1867_s28  ;;  %s2085_s28 = smov 15  }
  0x1b   : > { %354 = vperm.xlu1 %1943, %v342_v5   ;;  %v332_v6 = vld [vmem:[%s330_s16 + $0x8] sm:$0xff]  ;;  %v334_v7 = vld [vmem:[%s330_s16 + $0x18] sm:$0xff]  ;;  %v331_v8 = vld [vmem:[%s330_s16] sm:$0xff]  ;;  %s3642_s14 = smov 112   ;;  %s2089_s17 = smov 1  }
  0x1c   : > { %v1869_v9 = vpack.c.bf16 %v334_v7, %v332_v6  ;;  %v333_v10 = vld [vmem:[%s330_s16 + $0x10] sm:$0xff]  ;;  %1948 = vset.pattern.permute.xlu0 %v3592_v12  ;;  %s2088_s16 = smov 16   ;;  %s3640_s21 = smov 127  }
  0x1d   : > { %v1871_v13 = vpack.c.bf16 %v333_v10, %v331_v8  ;;  %923 = vperm.xlu0 %1948, %v2216_v11   ;;  %s3636_s22 = smov 113   ;;  %s3638_s23 = smov 111  }
  0x1e   : > { %1870 = vmatprep.subr.bf16.mxu0 %v1869_v9  ;;  %s3769_s26 = smov 127   ;;  %s3770_s27 = smov 111  }
  0x1f   : > { %584 = vperm.xlu1 %1943, %v2203_v3   ;;  %1872 = vmatpush1.bf16.msra.mxu0 %v1871_v13 }
  0x21   : > { %1953 = vset.pattern.permute.xlu0 %v3584_v15 }
  0x22   : > { %1852 = vmatmul.mubr.msk.f32.vlgmr.msra.gmra.mrb[0].mxu0 %vm3629_vm0, %v335_v14  ;;  %1119 = vperm.xlu0 %1953, %v2216_v11  }
  0x23   : > { %1944 = vset.pattern.permute.xlu1 %v3594_v16  ;;  %466 = vmatprep.mubr.f32.mxu0 %v3585_v2 }
  0x24   : > { %683 = vperm.xlu1 %1944, %v2203_v3  }
  0x26   : > { %1853 = vmatmul.mubr.msk.f32.gmra.mrb[2].mxu0 %vm3629_vm0, %v336_v17  ;;  %1954 = vset.pattern.permute.xlu0 %v3594_v16 }
  0x27   : > { %472 = vmatprep.mubr.f32.mxu0 %v3585_v2  ;;  %679 = vperm.xlu0 %1954, %v2216_v11  }
  0x28   : > { %1945 = vset.pattern.permute.xlu1 %v3591_v4 }
  0x29   : > { %778 = vperm.xlu1 %1945, %v2216_v11  }
  0x2a   : > { %1854 = vmatmul.mubr.msk.f32.gmra.mrb[4].mxu0 %vm3629_vm0, %v337_v18  ;;  %v339_v18 = vld [vmem:[%s3572_s1 + $0x20] sm:$0xff] }
  0x2b   : > { %478 = vmatprep.mubr.f32.mxu0 %v3585_v2  ;;  %675 = vperm.xlu0 %1954, %v2244_v19  }
  0x2d   : > { %1947 = vset.pattern.permute.xlu1 %v3590_v21 }
  0x2e   : > { %875 = vperm.xlu1 %1947, %v2216_v11   ;;  %1855 = vmatmul.mubr.msk.f32.gmra.mrb[6].mxu0 %vm3629_vm0, %v338_v20 }
  0x2f   : > { %1963 = vset.pattern.permute.xlu0 %v3590_v21  ;;  %484 = vmatprep.mubr.f32.mxu0 %v3585_v2 }
  0x30   : > { %871 = vperm.xlu0 %1963, %v2244_v19  }
  0x32   : > { %879 = vperm.xlu1 %1947, %v2203_v3   ;;  %1856 = vmatmul.mubr.msk.f32.gmra.mrb[8].mxu0 %vm3629_vm0, %v339_v18 }
  0x33   : > { %490 = vmatprep.mubr.f32.mxu0 %v3585_v2 }
  0x34   : > { %1964 = vset.pattern.permute.xlu0 %v3589_v22 }
  0x35   : > { %1024 = vperm.xlu0 %1964, %v2203_v3  }
  0x36   : > { %1949 = vset.pattern.permute.xlu1 %v3592_v12 }
  0x37   : > { %927 = vperm.xlu1 %1949, %v2203_v3  }
  0x39   : > { %1016 = vperm.xlu0 %1964, %v2244_v19  }
  0x3b   : > { %1950 = vset.pattern.permute.xlu1 %v3589_v22 }
  0x3c   : > { %1020 = vperm.xlu1 %1950, %v2216_v11  }
  0x3d   : > { %1969 = vset.pattern.permute.xlu0 %v3583_v23 }
  0x3e   : > { %1216 = vperm.xlu0 %1969, %v2216_v11  }
  0x40   : > { %1951 = vset.pattern.permute.xlu1 %v3581_v1 }
  0x41   : > { %569 = vperm.xlu1 %1951, %v510_v24  }
  0x42   : > { %1212 = vperm.xlu0 %1969, %v2244_v19  }
  0x45   : > { %1952 = vset.pattern.permute.xlu1 %v3594_v16 }
  0x46   : > { %671 = vperm.xlu1 %1952, %v510_v24   ;;  %1972 = vset.pattern.permute.xlu0 %v3587_v25 }
  0x47   : > { %1319 = vperm.xlu0 %1972, %v2203_v3  }
  0x4a   : > { %1955 = vset.pattern.permute.xlu1 %v3584_v15 }
  0x4b   : > { %1123 = vperm.xlu1 %1955, %v2203_v3   ;;  %1307 = vperm.xlu0 %1972, %v510_v24  }
  0x4f   : > { %1956 = vset.pattern.permute.xlu1 %v3591_v4  ;;  %1311 = vperm.xlu0 %1972, %v2244_v19  }
  0x50   : > { %770 = vperm.xlu1 %1956, %v510_v24  }
  0x53   : > { %1973 = vset.pattern.permute.xlu0 %v3581_v1 }
  0x54   : > { %1957 = vset.pattern.permute.xlu1 %v3583_v23  ;;  %359 = vperm.xlu0 %1973, %v343_v26   ;;  %v340_v26 = vld [vmem:[%s3572_s1 + $0x28] sm:$0xff] }
  0x55   : > { %1220 = vperm.xlu1 %1957, %v2203_v3   ;;  %1857 = vmatmul.mubr.msk.f32.gmra.mrb[10].mxu0 %vm3629_vm0, %v340_v26 }
  0x58   : > { %364 = vperm.xlu0 %1973, %v344_v27  }
  0x59   : > { %1958 = vset.pattern.permute.xlu1 %v3581_v1 }
  0x5a   : > { %574 = vperm.xlu1 %1958, %v2244_v19  }
  0x5c   : > { %579 = vperm.xlu0 %1973, %v2216_v11  }
  0x5e   : > { %1959 = vset.pattern.permute.xlu1 %v3590_v21 }
  0x5f   : > { %867 = vperm.xlu1 %1959, %v510_v24  }
  0x63   : > { %1960 = vset.pattern.permute.xlu1 %v3587_v25 }
  0x64   : > { %1315 = vperm.xlu1 %1960, %v2216_v11  }
  0x68   : > { %1961 = vset.pattern.permute.xlu1 %v3591_v4 }
  0x69   : > { %774 = vperm.xlu1 %1961, %v2244_v19  }
  0x6d   : > { %1962 = vset.pattern.permute.xlu1 %v3592_v12 }
  0x6e   : > { %915 = vperm.xlu1 %1962, %v510_v24  }
  0x72   : > { %1965 = vset.pattern.permute.xlu1 %v3589_v22 }
  0x73   : > { %1012 = vperm.xlu1 %1965, %v510_v24  }
  0x77   : > { %1966 = vset.pattern.permute.xlu1 %v3581_v1 }
  0x78   : > { %1372 = vperm.xlu1 %1966, %v1356_v28  }
  0x7c   : > { %1967 = vset.pattern.permute.xlu1 %v3592_v12 }
  0x7d   : > { %919 = vperm.xlu1 %1967, %v2244_v19  }
  0x81   : > { %1968 = vset.pattern.permute.xlu1 %v3584_v15 }
  0x82   : > { %1111 = vperm.xlu1 %1968, %v510_v24  }
  0x86   : > { %1970 = vset.pattern.permute.xlu1 %v3583_v23  ;;  %v1355_v23 = vld [vmem:[%s3575_s4 + $0x8] sm:$0xff] }
  0x87   : > { %1208 = vperm.xlu1 %1970, %v510_v24  }
  0x8b   : > { %1971 = vset.pattern.permute.xlu1 %v3584_v15 }
  0x8c   : > { %1115 = vperm.xlu1 %1971, %v2244_v19  }
  0x90   : > { %1974 = vset.pattern.permute.xlu1 %v3581_v1 }
  0x96   : > { %v350_v31 = vpop.permute.xlu1 %349 }
  0x97   : > { %v2311_v29 = vpop.permute.xlu0 %782 }
  0x98   : > { %3646 = vst [vmem:[#allocation5_spill] sm:$0xff] %v2311_v29 }
  0x9a   : > { %v355_v33 = vpop.permute.xlu1 %354 }
  0x9c   : > { %v2313_v30 = vpop.permute.xlu0 %923 }
  0x9e   : > { %v2319_v35 = vpop.permute.xlu1 %584 }
  0x9f   : > { %3647 = vst [vmem:[#allocation6_spill] sm:$0xff] %v2319_v35 }
  0xa1   : > { %v2315_v32 = vpop.permute.xlu0 %1119 }
  0xa3   : > { %v2323_v37 = vpop.permute.xlu1 %683 }
  0xa4   : > { %3649 = vst [vmem:[#allocation8_spill] sm:$0xff] %v2323_v37 }
  0xa6   : > { %v2317_v34 = vpop.permute.xlu0 %679 }
  0xa8   : > { %v2327_v39 = vpop.permute.xlu1 %778 }
  0xaa   : > { %v2321_v36 = vpop.permute.xlu0 %675 }
  0xab   : > { %3648 = vst [vmem:[#allocation7_spill] sm:$0xff] %v2321_v36 }
  0xad   : > { %v2331_v41 = vpop.permute.xlu1 %875 }
  0xaf   : > { %v2325_v38 = vpop.permute.xlu0 %871 }
  0xb0   : > { %3650 = vst [vmem:[#allocation9_spill] sm:$0xff] %v2325_v38 }
  0xb1   : > { %v2341_v47 = vpop.permute.xlu1 %879 }
  0xb2   : > { %3653 = vst [vmem:[#allocation12_spill] sm:$0xff] %v2341_v47 }
  0xb4   : > { %v2329_v40 = vpop.permute.xlu0 %1024 }
  0xb5   : > { %3651 = vst [vmem:[#allocation10_spill] sm:$0xff] %v2329_v40 }
  0xb6   : > { %v2351_v53 = vpop.permute.xlu1 %927 }
  0xb7   : > { %3654 = vst [vmem:[#allocation13_spill] sm:$0xff] %v2351_v53 }
  0xb8   : > { %v2335_v45 = vpop.permute.xlu0 %1016 }
  0xb9   : > { %3652 = vst [vmem:[#allocation11_spill] sm:$0xff] %v2335_v45 }
  0xbb   : > { %v2367_v57 = vpop.permute.xlu1 %1020 }
  0xbd   : > { %v2347_v49 = vpop.permute.xlu0 %1216 }
  0xc0   : > { %v2375_v59 = vpop.permute.xlu1 %569 }
  0xc1   : > { %v2361_v56 = vpop.permute.xlu0 %1212 }
  0xc2   : > { %3655 = vst [vmem:[#allocation14_spill] sm:$0xff] %v2361_v56 }
  0xc5   : > { %v2389_v62 = vpop.permute.xlu1 %671 }
  0xc6   : > { %v2373_v58 = vpop.permute.xlu0 %1319 }
  0xc7   : > { %3656 = vst [vmem:[#allocation15_spill] sm:$0xff] %v2373_v58 }
  0xca   : > { %v2383_v61 = vpop.permute.xlu0 %1307  ;;  %v2399_v3 = vpop.permute.xlu1 %1123 }
  0xcb   : > { %3658 = vst [vmem:[#allocation17_spill] sm:$0xff] %v2383_v61  ;;  %3661 = vst [vmem:[#allocation20_spill] sm:$0xff] %v2399_v3  ;;  %v497_v61 = vlaneseq }
  0xcd   : > { %v2601_v3 = vand.u32 127, %v497_v61 }
  0xce   : > { %v2397_v0 = vpop.permute.xlu0 %1311 }
  0xcf   : > { %3660 = vst [vmem:[#allocation19_spill] sm:$0xff] %v2397_v0  ;;  %v2409_v6 = vpop.permute.xlu1 %770  ;;  %v2606_v29 = vadd.s32 128, %v2601_v3  ;;  %vm540_vm1 = vcmp.lt.s32.totalorder %v2601_v3, 17  ;;  %vm3634_vm2 = vcmp.ge.s32.totalorder %v2601_v3, 16  ;;  %vm645_vm4 = vcmp.lt.s32.totalorder %v2601_v3, 16 }
  0xd0   : > { %vm3635_vm7 = vcmp.lt.s32.totalorder %v2601_v3, 1  ;;  %vm3631_vm10 = vcmp.lt.s32.totalorder %v2601_v3, 127  ;;  %vm3633_vm11 = vcmp.lt.s32.totalorder %v2601_v3, 15  ;;  %vm3630_vm14 = vcmp.lt.s32.totalorder %v2601_v3, 113 }
  0xd1   : > { %vm505_vm12 = vcmp.lt.s32.totalorder %v2606_v29, 240  ;;  %vm3632_vm15 = vcmp.lt.s32.totalorder %v2601_v3, 111 }
  0xd3   : > { %v360_v5 = vpop.permute.xlu0 %359 }
  0xd4   : > { %v2417_v8 = vpop.permute.xlu1 %1220 }
  0xd5   : > { %3662 = vst [vmem:[#allocation21_spill] sm:$0xff] %v2417_v8 }
  0xd7   : > { %v365_v19 = vpop.permute.xlu0 %364 }
  0xd9   : > { %v2427_v9 = vpop.permute.xlu1 %574 }
  0xda   : > { %3663 = vst [vmem:[#allocation22_spill] sm:$0xff] %v2427_v9 }
  0xde   : > { %v2433_v10 = vpop.permute.xlu1 %867 }
  0xe3   : > { %v2445_v13 = vpop.permute.xlu1 %1315 }
  0xe8   : > { %v2451_v14 = vpop.permute.xlu1 %774 }
  0xe9   : > { %3664 = vst [vmem:[#allocation23_spill] sm:$0xff] %v2451_v14  ;;  %v500_v14 = vand.u32 15, %v2601_v3 }
  0xeb   : > { %vm2612_vm3 = vcmp.ge.s32.totalorder %v500_v14, 1  ;;  %vm2644_vm8 = vcmp.le.s32.totalorder %v500_v14, 14 }
  0xec   : > { %vm2635_vm6 = vmand %vm3634_vm2, %vm2612_vm3 }
  0xed   : > { %v2461_v17 = vpop.permute.xlu1 %915  ;;  %vm2670_vm13 = vmand %vm3634_vm2, %vm2644_vm8 }
  0xf2   : > { %v2475_v24 = vpop.permute.xlu1 %1012 }
  0xf5   : > { %v462_v42 = vpop.f32.mrb[0].mxu0 }
  0xf6   : > { %v2333_v43 = vadd.f32 %v462_v42, %v350_v31  ;;  %v464_v44 = vpop.f32.mrb[1].mxu0 }
  0xf7   : > { %v2349_v51 = vadd.f32 %v464_v44, %v350_v31  ;;  %v2489_v27 = vpop.permute.xlu1 %1372 }
  0xf8   : > { %718 = vrot.lane.b32.xlu0 %v2333_v43, %s2085_s28  ;;  %516 = vrot.lane.b32.xlu1 %v2333_v43, %s2086_s29 }
  0xf9   : > { %v468_v46 = vpop.f32.mrb[2].mxu0 }
  0xfa   : > { %v470_v48 = vpop.f32.mrb[3].mxu0  ;;  %v2381_v60 = vadd.f32 %v468_v46, %v355_v33  ;;  %v1354_v46 = vld [vmem:[%s3575_s4] sm:$0xff] }
  0xfb   : > { %v2391_v63 = vadd.f32 %v470_v48, %v355_v33  ;;  %v1357_v33 = vld [vmem:[%s3575_s4 + $0x18] sm:$0xff] }
  0xfc   : > { %1158 = vrot.lane.b32.xlu0 %v2333_v43, %s3642_s14  ;;  %621 = vrot.lane.b32.xlu1 %v2333_v43, %s2088_s16  ;;  %3657 = vst [vmem:[#allocation16_spill] sm:$0xff] %v2381_v60  ;;  %v2498_v31 = vpop.permute.xlu1 %919 }
  0xfd   : > { %v474_v50 = vpop.f32.mrb[4].mxu0  ;;  %3659 = vst [vmem:[#allocation18_spill] sm:$0xff] %v2391_v63  ;;  %3667 = vst [vmem:[#allocation26_spill] sm:$0xff] %v2498_v31 }
  0xfe   : > { %v476_v52 = vpop.f32.mrb[5].mxu0  ;;  %v2411_v7 = vadd.f32 %v474_v50, %v360_v5  ;;  %v2528_v50 = vpop.permute.xlu0 %579 }
  0xff   : > { %v2439_v11 = vadd.f32 %v476_v52, %v360_v5 }
 0x100   : > { %528 = vrot.lane.b32.xlu0 %v2349_v51, %s2086_s29  ;;  %817 = vrot.lane.b32.xlu1 %v2333_v43, %s2089_s17 }
 0x101   : > { %v2357_v54 = vpop.f32.mrb[6].mxu0  ;;  %v2509_v42 = vpop.permute.xlu1 %1111 }
 0x102   : > { %v2359_v55 = vpop.f32.mrb[7].mxu0  ;;  %v2473_v20 = vadd.f32 %v2357_v54, %v365_v19  ;;  %3668 = vst [vmem:[#allocation27_spill] sm:$0xff] %v2509_v42 }
 0x103   : > { %v2496_v28 = vadd.f32 %v2359_v55, %v365_v19 }
 0x104   : > { %633 = vrot.lane.b32.xlu0 %v2349_v51, %s2088_s16  ;;  %962 = vrot.lane.b32.xlu1 %v2333_v43, %s3640_s21  ;;  %3665 = vst [vmem:[#allocation24_spill] sm:$0xff] %v2473_v20 }
 0x105   : > { %3666 = vst [vmem:[#allocation25_spill] sm:$0xff] %v2496_v28 }
 0x106   : > { %v2515_v44 = vpop.permute.xlu1 %1208 }
 0x107   : > { %3669 = vst [vmem:[#allocation28_spill] sm:$0xff] %v2515_v44 }
 0x108   : > { %829 = vrot.lane.b32.xlu0 %v2349_v51, %s2089_s17  ;;  %1059 = vrot.lane.b32.xlu1 %v2333_v43, %s3636_s22 }
 0x10b   : > { %v2526_v48 = vpop.permute.xlu1 %1115 }
 0x10c   : > { %974 = vrot.lane.b32.xlu0 %v2349_v51, %s3640_s21  ;;  %730 = vrot.lane.b32.xlu1 %v2349_v51, %s2085_s28  ;;  %3670 = vst [vmem:[#allocation29_spill] sm:$0xff] %v2526_v48 }
 0x110   : > { %720 = vrot.lane.b32.xlu0 %v2381_v60, %s2085_s28  ;;  %1071 = vrot.lane.b32.xlu1 %v2349_v51, %s3636_s22 }
 0x114   : > { %530 = vrot.lane.b32.xlu0 %v2391_v63, %s2086_s29  ;;  %1170 = vrot.lane.b32.xlu1 %v2349_v51, %s3642_s14 }
 0x118   : > { %635 = vrot.lane.b32.xlu0 %v2391_v63, %s2088_s16  ;;  %518 = vrot.lane.b32.xlu1 %v2381_v60, %s2086_s29 }
 0x11c   : > { %831 = vrot.lane.b32.xlu0 %v2391_v63, %s2089_s17  ;;  %623 = vrot.lane.b32.xlu1 %v2381_v60, %s2088_s16 }
 0x120   : > { %520 = vrot.lane.b32.xlu0 %v2411_v7, %s2086_s29  ;;  %819 = vrot.lane.b32.xlu1 %v2381_v60, %s2089_s17 }
 0x124   : > { %625 = vrot.lane.b32.xlu0 %v2411_v7, %s2088_s16  ;;  %964 = vrot.lane.b32.xlu1 %v2381_v60, %s3640_s21 }
 0x128   : > { %821 = vrot.lane.b32.xlu0 %v2411_v7, %s2089_s17  ;;  %732 = vrot.lane.b32.xlu1 %v2391_v63, %s2085_s28 }
 0x12c   : > { %1063 = vrot.lane.b32.xlu0 %v2411_v7, %s3636_s22  ;;  %976 = vrot.lane.b32.xlu1 %v2391_v63, %s3640_s21 }
 0x130   : > { %1259 = vrot.lane.b32.xlu0 %v2411_v7, %s3638_s23  ;;  %722 = vrot.lane.b32.xlu1 %v2411_v7, %s2085_s28 }
 0x134   : > { %532 = vrot.lane.b32.xlu0 %v2439_v11, %s2086_s29  ;;  %966 = vrot.lane.b32.xlu1 %v2411_v7, %s3640_s21 }
 0x138   : > { %637 = vrot.lane.b32.xlu0 %v2439_v11, %s2088_s16  ;;  %1162 = vrot.lane.b32.xlu1 %v2411_v7, %s3642_s14 }
 0x13c   : > { %833 = vrot.lane.b32.xlu0 %v2439_v11, %s2089_s17  ;;  %734 = vrot.lane.b32.xlu1 %v2439_v11, %s2085_s28 }
 0x140   : > { %1075 = vrot.lane.b32.xlu0 %v2439_v11, %s3636_s22  ;;  %978 = vrot.lane.b32.xlu1 %v2439_v11, %s3640_s21 }
 0x144   : > { %1271 = vrot.lane.b32.xlu0 %v2439_v11, %s3638_s23  ;;  %1174 = vrot.lane.b32.xlu1 %v2439_v11, %s3642_s14 }
 0x148   : > { %724 = vrot.lane.b32.xlu0 %v2473_v20, %s2085_s28  ;;  %522 = vrot.lane.b32.xlu1 %v2473_v20, %s2086_s29 }
 0x14c   : > { %968 = vrot.lane.b32.xlu0 %v2473_v20, %s3640_s21  ;;  %627 = vrot.lane.b32.xlu1 %v2473_v20, %s2088_s16 }
 0x150   : > { %1164 = vrot.lane.b32.xlu0 %v2473_v20, %s3642_s14  ;;  %823 = vrot.lane.b32.xlu1 %v2473_v20, %s2089_s17 }
 0x154   : > { %736 = vrot.lane.b32.xlu0 %v2496_v28, %s2085_s28  ;;  %1065 = vrot.lane.b32.xlu1 %v2473_v20, %s3636_s22 }
 0x158   : > { %1377 = vperm.xlu0 %1973, %v1357_v33   ;;  %1261 = vrot.lane.b32.xlu1 %v2473_v20, %s3638_s23 }
 0x15c   : > { %980 = vrot.lane.b32.xlu0 %v2496_v28, %s3640_s21  ;;  %534 = vrot.lane.b32.xlu1 %v2496_v28, %s2086_s29  ;;  %s3767_s21 = smov 112  }
 0x160   : > { %1176 = vrot.lane.b32.xlu0 %v2496_v28, %s3642_s14  ;;  %639 = vrot.lane.b32.xlu1 %v2496_v28, %s2088_s16 }
 0x164   : > { %1073 = vrot.lane.b32.xlu0 %v2391_v63, %s3636_s22  ;;  %1362 = vperm.xlu1 %1974, %v1354_v46  }
 0x168   : > { %1267 = vrot.lane.b32.xlu0 %v2349_v51, %s3638_s23  ;;  %1061 = vrot.lane.b32.xlu1 %v2381_v60, %s3636_s22 }
 0x16a   : > { %v2534_v52 = vpop.permute.xlu0 %718  ;;  %v2536_v54 = vpop.permute.xlu1 %516 }
 0x16c   : > { %1172 = vrot.lane.b32.xlu0 %v2391_v63, %s3642_s14  ;;  %835 = vrot.lane.b32.xlu1 %v2496_v28, %s2089_s17 }
 0x16e   : > { %v2542_v55 = vpop.permute.xlu0 %1158  ;;  %v2544_v5 = vpop.permute.xlu1 %621 }
 0x170   : > { %1257 = vrot.lane.b32.xlu0 %v2381_v60, %s3638_s23  ;;  %1077 = vrot.lane.b32.xlu1 %v2496_v28, %s3636_s22  ;;  %s3771_s22 = smov 113  }
 0x172   : > { %v2550_v18 = vpop.permute.xlu0 %528  ;;  %v2552_v19 = vpop.permute.xlu1 %817 }
 0x174   : > { %1273 = vrot.lane.b32.xlu1 %v2496_v28, %s3638_s23 }
 0x176   : > { %v2556_v26 = vpop.permute.xlu0 %633  ;;  %v2558_v33 = vpop.permute.xlu1 %962 }
 0x178   : > { %1255 = vrot.lane.b32.xlu1 %v2333_v43, %s3638_s23 }
 0x17a   : > { %v2562_v46 = vpop.permute.xlu0 %829  ;;  %v2564_v1 = vpop.permute.xlu1 %1059 }
 0x17c   : > { %1160 = vrot.lane.b32.xlu1 %v2381_v60, %s3642_s14  ;;  %s1868_s14 = sshll.u32 %s2166_s13, 9 }
 0x17d   : > { %s3527_s24 = scalar_lea.hbm %s3580_s9, %s1868_s14 }
 0x17e   : > { %v2571_v15 = vpop.permute.xlu0 %974  ;;  %v2573_v2 = vpop.permute.xlu1 %730 }
 0x180   : > { %1367 = vperm.xlu1 %1974, %v1355_v23  }
 0x182   : > { %v2575_v25 = vpop.permute.xlu0 %720  ;;  %v2577_v22 = vpop.permute.xlu1 %1071 }
 0x183   : > { %3671 = vst [vmem:[#allocation30_spill] sm:$0xff] %v2575_v25 }
 0x184   : > { %1269 = vrot.lane.b32.xlu1 %v2391_v63, %s3638_s23 }
 0x186   : > { %v2581_v21 = vpop.permute.xlu0 %530  ;;  %v2583_v4 = vpop.permute.xlu1 %1170 }
 0x187   : > { %3672 = vst [vmem:[#allocation31_spill] sm:$0xff] %v2581_v21 }
 0x18a   : > { %v2585_v12 = vpop.permute.xlu0 %635  ;;  %v2587_v16 = vpop.permute.xlu1 %518 }
 0x18b   : > { %3673 = vst [vmem:[#allocation32_spill] sm:$0xff] %v2585_v12  ;;  %3674 = vst [vmem:[#allocation33_spill] sm:$0xff] %v2587_v16 }
 0x18e   : > { %v2589_v0 = vpop.permute.xlu0 %831  ;;  %v2591_v56 = vpop.permute.xlu1 %623 }
 0x18f   : > { %3675 = vst [vmem:[#allocation34_spill] sm:$0xff] %v2589_v0 }
 0x192   : > { %v521_v23 = vpop.permute.xlu0 %520  ;;  %v2593_v48 = vpop.permute.xlu1 %819 }
 0x193   : > { %3676 = vst [vmem:[#allocation35_spill] sm:$0xff] %v2593_v48 }
 0x196   : > { %v626_v45 = vpop.permute.xlu0 %625  ;;  %v2595_v31 = vpop.permute.xlu1 %964 }
 0x197   : > { %3677 = vst [vmem:[#allocation36_spill] sm:$0xff] %v2595_v31  ;;  %v501_v31 = vand.u32 15, %v2606_v29 }
 0x199   : > { %vm2623_vm5 = vcmp.ge.s32.totalorder %v501_v31, 1  ;;  %vm2648_vm9 = vcmp.le.s32.totalorder %v501_v31, 14 }
 0x19a   : > { %v822_v60 = vpop.permute.xlu0 %821  ;;  %v2597_v63 = vpop.permute.xlu1 %732  ;;  %vm2703_vm0 = vmand %vm505_vm12, %vm2623_vm5 }
 0x19b   : > { %3678 = vst [vmem:[#allocation37_spill] sm:$0xff] %v2597_v63 }
 0x19e   : > { %v1064_v58 = vpop.permute.xlu0 %1063  ;;  %v2599_v8 = vpop.permute.xlu1 %976 }
 0x19f   : > { %3679 = vst [vmem:[#allocation38_spill] sm:$0xff] %v2599_v8 }
 0x1a2   : > { %v2603_v40 = vpop.permute.xlu0 %1259  ;;  %v723_v47 = vpop.permute.xlu1 %722 }
 0x1a6   : > { %v533_v38 = vpop.permute.xlu0 %532  ;;  %v967_v35 = vpop.permute.xlu1 %966 }
 0x1a7   : > { %v543_v61 = vsel %vm540_vm1, %v521_v23, %v533_v38  ;;  %v549_v37 = vsel %vm540_vm1, %v533_v38, %v521_v23 }
 0x1a8   : > { %v560_v38 = vsel %vm2623_vm5, %v543_v61, 0.0 }
 0x1a9   : > { %v602_v31 = vmul.f32 %v2528_v50, %v560_v38 }
 0x1aa   : > { %v638_v9 = vpop.permute.xlu0 %637  ;;  %v2621_v63 = vpop.permute.xlu1 %1162 }
 0x1ab   : > { %v648_v0 = vsel %vm645_vm4, %v626_v45, %v638_v9  ;;  %v654_v48 = vsel %vm645_vm4, %v638_v9, %v626_v45  ;;  %v559_v9 = vsel %vm2635_vm6, %v549_v37, 0.0 }
 0x1ac   : > { %v662_v23 = vsel %vm3634_vm2, %v654_v48, 0.0  ;;  %v699_v16 = vmul.f32 %v2317_v34, %v648_v0 }
 0x1ad   : > { %v698_v14 = vmul.f32 %v2317_v34, %v662_v23  ;;  %v601_v34 = vmul.f32 %v2528_v50, %v559_v9 }
 0x1ae   : > { %v834_v48 = vpop.permute.xlu0 %833  ;;  %v735_v61 = vpop.permute.xlu1 %734 }
 0x1af   : > { %v844_v21 = vsel %vm3635_vm7, %v822_v60, %v834_v48  ;;  %v850_v37 = vsel %vm3635_vm7, %v834_v48, %v822_v60  ;;  %v745_v0 = vsel %vm3633_vm11, %v723_v47, %v735_v61  ;;  %v751_v23 = vsel %vm3633_vm11, %v735_v61, %v723_v47 }
 0x1b0   : > { %v859_v38 = vsel %vm2623_vm5, %v844_v21, 0.0  ;;  %v762_v60 = vsel %vm2648_vm9, %v745_v0, 0.0  ;;  %v711_v48 = vadd.f32 %v699_v16, %v602_v31  ;;  %v858_v53 = vsel %vm2612_vm3, %v850_v37, 0.0 }
 0x1b1   : > { %v761_v20 = vsel %vm2670_vm13, %v751_v23, 0.0  ;;  %v798_v42 = vmul.f32 %v2327_v39, %v762_v60  ;;  %v710_v50 = vadd.f32 %v698_v14, %v601_v34  ;;  %v895_v47 = vmul.f32 %v2331_v41, %v859_v38 }
 0x1b2   : > { %v797_v21 = vmul.f32 %v2327_v39, %v761_v20  ;;  %v1076_v9 = vpop.permute.xlu0 %1075  ;;  %v979_v12 = vpop.permute.xlu1 %978  ;;  %v894_v37 = vmul.f32 %v2331_v41, %v858_v53  ;;  %v943_v34 = vmul.f32 %v2313_v30, %v2439_v11 }
 0x1b3   : > { %v810_v16 = vadd.f32 %v798_v42, %v711_v48  ;;  %v1092_v61 = vsel %vm3630_vm14, %v1076_v9, %v1064_v58  ;;  %v989_v31 = vsel %vm3631_vm10, %v967_v35, %v979_v12  ;;  %v1086_v14 = vsel %vm3630_vm14, %v1064_v58, %v1076_v9  ;;  %vm2724_vm14 = vmand %vm505_vm12, %vm2648_vm9 }
 0x1b4   : > { %v809_v0 = vadd.f32 %v797_v21, %v710_v50  ;;  %v995_v39 = vsel %vm3631_vm10, %v979_v12, %v967_v35  ;;  %v1003_v41 = vsel %vm2644_vm8, %v989_v31, 0.0  ;;  %v1103_v58 = vsel %vm2703_vm0, %v1092_v61, 0.0 }
 0x1b5   : > { %v907_v42 = vadd.f32 %v895_v47, %v810_v16  ;;  %v942_v12 = vmul.f32 %v2313_v30, %v2411_v7  ;;  %v1004_v35 = vsel %vm2648_vm9, %v995_v39, 0.0  ;;  %v1102_v60 = vsel %vm2612_vm3, %v1086_v14, 0.0 }
 0x1b6   : > { %v906_v53 = vadd.f32 %v894_v37, %v809_v0  ;;  %v1272_v38 = vpop.permute.xlu0 %1271  ;;  %v1175_v23 = vpop.permute.xlu1 %1174  ;;  %v1040_v11 = vmul.f32 %v2367_v57, %v1004_v35  ;;  %vm1182_vm10 = vcmp.lt.s32.totalorder %v2601_v3, 112  ;;  %v1039_v21 = vmul.f32 %v2367_v57, %v1003_v41 }
 0x1b7   : > { %v955_v48 = vadd.f32 %v943_v34, %v907_v42  ;;  %v1288_v30 = vsel %vm3632_vm15, %v1272_v38, %v2603_v40  ;;  %v1282_v9 = vsel %vm3632_vm15, %v2603_v40, %v1272_v38  ;;  %v1139_v47 = vmul.f32 %v2315_v32, %v1103_v58 }
 0x1b8   : > { %v954_v7 = vadd.f32 %v942_v12, %v906_v53  ;;  %v1185_v61 = vsel %vm1182_vm10, %v2621_v63, %v1175_v23  ;;  %v1191_v31 = vsel %vm1182_vm10, %v1175_v23, %v2621_v63  ;;  %v1138_v37 = vmul.f32 %v2315_v32, %v1102_v60 }
 0x1b9   : > { %v1052_v16 = vadd.f32 %v1040_v11, %v955_v48  ;;  %v1299_v57 = vsel %vm2724_vm14, %v1288_v30, 0.0  ;;  %v1200_v40 = vsel %vm505_vm12, %v1191_v31, 0.0  ;;  %v1298_v39 = vsel %vm2644_vm8, %v1282_v9, 0.0 }
 0x1ba   : > { %v1051_v0 = vadd.f32 %v1039_v21, %v954_v7  ;;  %v2748_v14 = vpop.permute.xlu1 %522  ;;  %v1236_v34 = vmul.f32 %v2347_v49, %v1200_v40  ;;  %v1235_v63 = vmul.f32 %v2347_v49, %v1185_v61  ;;  %v1335_v32 = vmul.f32 %v2445_v13, %v1299_v57 }
 0x1bb   : > { %v1151_v42 = vadd.f32 %v1139_v47, %v1052_v16  ;;  %v1334_v58 = vmul.f32 %v2445_v13, %v1298_v39  ;;  %v652_v13 = vsel %vm645_vm4, %v2556_v26, %v2544_v5  ;;  %v547_v21 = vsel %vm540_vm1, %v2550_v18, %v2536_v54  ;;  %v2790_v16 = vpop.permute.xlu0 %724 }
 0x1bc   : > { %v1150_v41 = vadd.f32 %v1138_v37, %v1051_v0  ;;  %v743_v9 = vsel %vm3633_vm11, %v2534_v52, %v2573_v2  ;;  %v749_v47 = vsel %vm3633_vm11, %v2573_v2, %v2534_v52  ;;  %v646_v61 = vsel %vm645_vm4, %v2544_v5, %v2556_v26 }
 0x1bd   : > { %v1248_v53 = vadd.f32 %v1236_v34, %v1151_v42  ;;  %v757_v2 = vsel %vm2670_vm13, %v749_v47, 0.0  ;;  %v758_v52 = vsel %vm2648_vm9, %v743_v9, 0.0  ;;  %v695_v5 = vmul.f32 %v2389_v62, %v646_v61 }
 0x1be   : > { %v1247_v12 = vadd.f32 %v1235_v63, %v1150_v41  ;;  %v2756_v35 = vpop.permute.xlu1 %627  ;;  %v842_v40 = vsel %vm3635_vm7, %v2552_v19, %v2562_v46  ;;  %v848_v39 = vsel %vm3635_vm7, %v2562_v46, %v2552_v19  ;;  %v793_v42 = vmul.f32 %v2409_v6, %v757_v2 }
 0x1bf   : > { %v1347_v38 = vadd.f32 %v1335_v32, %v1248_v53  ;;  %v794_v34 = vmul.f32 %v2409_v6, %v758_v52  ;;  %v2822_v41 = vpop.permute.xlu0 %968  ;;  %v855_v32 = vsel %vm2623_vm5, %v842_v40, 0.0  ;;  %vm3696_vm15 = vcmp.lt.s32.totalorder %v2601_v3, 127  ;;  %v3702_v40 = vld [vmem:[#allocation24_spill] sm:$0xff] }
 0x1c0   : > { %v1346_v23 = vadd.f32 %v1334_v58, %v1247_v12  ;;  %v891_v46 = vmul.f32 %v2433_v10, %v855_v32  ;;  %v987_v6 = vsel %vm3696_vm15, %v2558_v33, %v2571_v15  ;;  %vm3697_vm11 = vmmov %vm3696_vm15  ;;  %vm3698_vm15 = vcmp.lt.s32.totalorder %v2601_v3, 113 }
 0x1c1   : > { %v2759_v60 = vadd.f32 %v2489_v27, %v1347_v38 }
 0x1c2   : > { %v2762_v48 = vadd.f32 %v2489_v27, %v1346_v23  ;;  %v2768_v30 = vpop.permute.xlu1 %823  ;;  %v541_v27 = vsel %vm540_vm1, %v2536_v54, %v2550_v18  ;;  %v658_v54 = vsel %vm3634_vm2, %v652_v13, 0.0  ;;  %v555_v18 = vsel %vm2635_vm6, %v547_v21, 0.0 }
 0x1c3   : > { %v1407_v11 = vmul.f32 %v2759_v60, %v2759_v60  ;;  %v556_v31 = vsel %vm2623_vm5, %v541_v27, 0.0  ;;  %v694_v0 = vmul.f32 %v2389_v62, %v658_v54  ;;  %v597_v26 = vmul.f32 %v2375_v59, %v555_v18  ;;  %v2832_v38 = vpop.permute.xlu0 %1164 }
 0x1c4   : > { %v1406_v49 = vmul.f32 %v2762_v48, %v2762_v48  ;;  %v598_v57 = vmul.f32 %v2375_v59, %v556_v31  ;;  %v854_v59 = vsel %vm2612_vm3, %v848_v39, 0.0  ;;  %v993_v23 = vsel %vm3697_vm11, %v2571_v15, %v2558_v33  ;;  %vm3699_vm11 = vmmov %vm3698_vm15  ;;  %v3703_v39 = vld [vmem:[#allocation13_spill] sm:$0xff] }
 0x1c5   : > { %v706_v62 = vadd.f32 %v694_v0, %v597_v26  ;;  %v890_v19 = vmul.f32 %v2433_v10, %v854_v59  ;;  %v938_v10 = vmul.f32 %v2461_v17, %v2333_v43  ;;  %v999_v27 = vsel %vm2644_vm8, %v987_v6, 0.0  ;;  %v3700_v0 = vld [vmem:[#allocation32_spill] sm:$0xff]  ;;  %v3701_v26 = vld [vmem:[#allocation27_spill] sm:$0xff] }
 0x1c6   : > { %v1416_v7 = vadd.f32 %v1407_v11, %v1406_v49  ;;  %v2806_v37 = vpop.permute.xlu1 %1065  ;;  %v707_v63 = vadd.f32 %v695_v5, %v598_v57  ;;  %v1000_v21 = vsel %vm2648_vm9, %v993_v23, 0.0  ;;  %v1084_v15 = vsel %vm3698_vm15, %v2564_v1, %v2577_v22 }
 0x1c7   : > { %v805_v58 = vadd.f32 %v793_v42, %v706_v62  ;;  %v737_v47 = vpop.permute.xlu0 %736  ;;  %v1189_v43 = vsel %vm1182_vm10, %v2583_v4, %v2542_v55  ;;  %v1036_v61 = vmul.f32 %v2475_v24, %v1000_v21  ;;  %v1098_v54 = vsel %vm2612_vm3, %v1084_v15, 0.0  ;;  %v3705_v62 = vld [vmem:[#allocation31_spill] sm:$0xff] }
 0x1c8   : > { %1417 = vadd.xlane.f32.xlu0 %v1416_v7  ;;  %v806_v12 = vadd.f32 %v794_v34, %v707_v63  ;;  %v939_v7 = vmul.f32 %v2461_v17, %v2349_v51  ;;  %v1090_v51 = vsel %vm3699_vm11, %v2577_v22, %v2564_v1  ;;  %v1035_v17 = vmul.f32 %v2475_v24, %v999_v27  ;;  %v3706_v63 = vld [vmem:[#allocation33_spill] sm:$0xff] }
 0x1c9   : > { %v902_v11 = vadd.f32 %v890_v19, %v805_v58  ;;  %v1099_v18 = vsel %vm2703_vm0, %v1090_v51, 0.0  ;;  %v1183_v1 = vsel %vm1182_vm10, %v2542_v55, %v2583_v4  ;;  %v1196_v52 = vsel %vm505_vm12, %v1189_v43, 0.0  ;;  %v3704_v4 = vld [vmem:[#allocation25_spill] sm:$0xff] }
 0x1ca   : > { %v2828_v53 = vpop.permute.xlu1 %1261  ;;  %v903_v49 = vadd.f32 %v891_v46, %v806_v12  ;;  %v653_v24 = vsel %vm645_vm4, %v3700_v0, %v2591_v56  ;;  %v1134_v57 = vmul.f32 %v3701_v26, %v1098_v54  ;;  %v2883_v42 = vmul.f32 %v3703_v39, %v3702_v40  ;;  %v3707_v12 = vld [vmem:[#allocation28_spill] sm:$0xff]  ;;  %v3712_v54 = vld [vmem:[#allocation37_spill] sm:$0xff] }
 0x1cb   : > { %v950_v9 = vadd.f32 %v938_v10, %v902_v11  ;;  %v2887_v55 = vmul.f32 %v3703_v39, %v3704_v4  ;;  %v1135_v34 = vmul.f32 %v3701_v26, %v1099_v18  ;;  %v542_v59 = vsel %vm540_vm1, %v3706_v63, %v3705_v62  ;;  %v3717_v26 = vld [vmem:[#allocation8_spill] sm:$0xff] }
 0x1cc   : > { %v951_v33 = vadd.f32 %v939_v7, %v903_v49  ;;  %v548_v32 = vsel %vm540_vm1, %v3705_v62, %v3706_v63  ;;  %v1231_v19 = vmul.f32 %v3707_v12, %v1183_v1  ;;  %v1232_v46 = vmul.f32 %v3707_v12, %v1196_v52  ;;  %v3716_v52 = vld [vmem:[#allocation22_spill] sm:$0xff] }
 0x1cd   : > { %v1047_v2 = vadd.f32 %v1035_v17, %v950_v9  ;;  %v647_v6 = vsel %vm645_vm4, %v2591_v56, %v3700_v0  ;;  %v660_v23 = vsel %vm3634_vm2, %v653_v24, 0.0  ;;  %v557_v27 = vsel %vm2635_vm6, %v548_v32, 0.0  ;;  %v3708_v9 = vld [vmem:[#allocation7_spill] sm:$0xff] }
 0x1ce   : > { %v535_v13 = vpop.permute.xlu1 %534  ;;  %v1048_v31 = vadd.f32 %v1036_v61, %v951_v33  ;;  %v558_v21 = vsel %vm2623_vm5, %v542_v59, 0.0  ;;  %v696_v51 = vmul.f32 %v3708_v9, %v660_v23  ;;  %v697_v43 = vmul.f32 %v3708_v9, %v647_v6  ;;  %v3711_v61 = vld [vmem:[#allocation30_spill] sm:$0xff]  ;;  %v3719_v9 = vld [vmem:[#allocation9_spill] sm:$0xff] }
 0x1cf   : > { %v1146_v11 = vadd.f32 %v1134_v57, %v1047_v2  ;;  %v544_v7 = vsel %vm540_vm1, %v2748_v14, %v535_v13  ;;  %v550_v10 = vsel %vm540_vm1, %v535_v13, %v2748_v14  ;;  %v3709_v14 = vld [vmem:[#allocation35_spill] sm:$0xff]  ;;  %v3710_v13 = vld [vmem:[#allocation34_spill] sm:$0xff]  ;;  %vm3713_vm15 = vcmp.lt.s32.totalorder %v2601_v3, 15 }
 0x1d0   : > { %v1147_v49 = vadd.f32 %v1135_v34, %v1048_v31  ;;  %v849_v17 = vsel %vm3635_vm7, %v3710_v13, %v3709_v14  ;;  %v750_v18 = vsel %vm3713_vm15, %v3712_v54, %v3711_v61  ;;  %vm3714_vm11 = vmmov %vm3713_vm15  ;;  %v561_v31 = vsel %vm2635_vm6, %v550_v10, 0.0  ;;  %v3718_v59 = vld [vmem:[#allocation6_spill] sm:$0xff] }
 0x1d1   : > { %v746_v1 = vsel %vm3714_vm11, %v2790_v16, %v737_v47  ;;  %v562_v2 = vsel %vm2623_vm5, %v544_v7, 0.0  ;;  %v599_v0 = vmul.f32 %v3716_v52, %v557_v27  ;;  %v600_v24 = vmul.f32 %v3716_v52, %v558_v21 }
 0x1d2   : > { %v640_v22 = vpop.permute.xlu1 %639  ;;  %v843_v39 = vsel %vm3635_vm7, %v3709_v14, %v3710_v13  ;;  %v759_v4 = vsel %vm2670_vm13, %v750_v18, 0.0  ;;  %v764_v63 = vsel %vm2648_vm9, %v746_v1, 0.0  ;;  %v603_v32 = vmul.f32 %v3718_v59, %v561_v31  ;;  %v3720_v13 = vld [vmem:[#allocation23_spill] sm:$0xff] }
 0x1d3   : > { %v655_v58 = vsel %vm645_vm4, %v640_v22, %v2756_v35  ;;  %v649_v56 = vsel %vm645_vm4, %v2756_v35, %v640_v22  ;;  %v2970_v12 = vadd.f32 %v1231_v19, %v1146_v11  ;;  %v2972_v6 = vadd.f32 %v1232_v46, %v1147_v49 }
 0x1d4   : > { %v664_v15 = vsel %vm3634_vm2, %v655_v58, 0.0  ;;  %vm3715_vm2 = vmmov %vm3714_vm11  ;;  %v701_v40 = vmul.f32 %v3717_v26, %v649_v56  ;;  %v604_v58 = vmul.f32 %v3718_v59, %v562_v2  ;;  %v708_v23 = vadd.f32 %v696_v51, %v599_v0  ;;  %v3727_v59 = vld [vmem:[#allocation38_spill] sm:$0xff] }
 0x1d5   : > { %v752_v22 = vsel %vm3715_vm2, %v737_v47, %v2790_v16  ;;  %v700_v57 = vmul.f32 %v3717_v26, %v664_v15  ;;  %v856_v16 = vsel %vm2612_vm3, %v849_v17, 0.0  ;;  %v744_v47 = vsel %vm3715_vm2, %v3711_v61, %v3712_v54  ;;  %v3721_v61 = vld [vmem:[#allocation5_spill] sm:$0xff] }
 0x1d6   : > { %v763_v62 = vsel %vm2670_vm13, %v752_v22, 0.0  ;;  %v709_v7 = vadd.f32 %v697_v43, %v600_v24  ;;  %v857_v10 = vsel %vm2623_vm5, %v843_v39, 0.0  ;;  %v760_v27 = vsel %vm2648_vm9, %v744_v47, 0.0 }
 0x1d7   : > { %v2878_v5 = vpop.permute.xlu0 %1377  ;;  %v712_v21 = vadd.f32 %v700_v57, %v603_v32  ;;  %v713_v56 = vadd.f32 %v701_v40, %v604_v58  ;;  %v892_v14 = vmul.f32 %v3719_v9, %v856_v16  ;;  %v795_v17 = vmul.f32 %v3720_v13, %v759_v4  ;;  %v3728_v32 = vld [vmem:[#allocation36_spill] sm:$0xff] }
 0x1d8   : > { %v799_v19 = vmul.f32 %v3721_v61, %v763_v62  ;;  %v800_v46 = vmul.f32 %v3721_v61, %v764_v63  ;;  %vm3722_vm15 = vcmp.lt.s32.totalorder %v2601_v3, 127  ;;  %v893_v18 = vmul.f32 %v3719_v9, %v857_v10 }
 0x1d9   : > { %vm3723_vm11 = vmmov %vm3722_vm15  ;;  %v796_v1 = vmul.f32 %v3720_v13, %v760_v27  ;;  %v807_v24 = vadd.f32 %v795_v17, %v708_v23  ;;  %vm3725_vm2 = vcmp.lt.s32.totalorder %v2601_v3, 113  ;;  %v3729_v27 = vld [vmem:[#allocation10_spill] sm:$0xff]  ;;  %v3730_v17 = vld [vmem:[#allocation20_spill] sm:$0xff] }
 0x1da   : > { %v812_v2 = vadd.f32 %v800_v46, %v713_v56  ;;  %v988_v58 = vsel %vm3723_vm11, %v3728_v32, %v3727_v59 }
 0x1db   : > { %v981_v35 = vpop.permute.xlu0 %980  ;;  %v808_v63 = vadd.f32 %v796_v1, %v709_v7 }
 0x1dc   : > { %v990_v49 = vsel %vm3722_vm15, %v2822_v41, %v981_v35  ;;  %v996_v51 = vsel %vm3723_vm11, %v981_v35, %v2822_v41  ;;  %v811_v41 = vadd.f32 %v799_v19, %v712_v21  ;;  %v3724_v35 = vld [vmem:[#allocation12_spill] sm:$0xff]  ;;  %vm3726_vm15 = vmmov %vm3725_vm2 }
 0x1dd   : > { %v1006_v26 = vsel %vm2648_vm9, %v996_v51, 0.0 }
 0x1de   : > { %v1042_v56 = vmul.f32 %v3729_v27, %v1006_v26 }
 0x1df   : > { %v1177_v15 = vpop.permute.xlu0 %1176 }
 0x1e0   : > { %v1192_v57 = vsel %vm1182_vm10, %v1177_v15, %v2832_v38  ;;  %v1186_v7 = vsel %vm1182_vm10, %v2832_v38, %v1177_v15  ;;  %v994_v38 = vsel %vm3723_vm11, %v3727_v59, %v3728_v32  ;;  %v1001_v15 = vsel %vm2644_vm8, %v988_v58, 0.0  ;;  %v3738_v59 = vld [vmem:[#allocation17_spill] sm:$0xff] }
 0x1e1   : > { %v1202_v13 = vsel %vm505_vm12, %v1192_v57, 0.0  ;;  %vm3736_vm11 = vcmp.lt.s32.totalorder %v2601_v3, 113 }
 0x1e3   : > { %v2924_v33 = vpop.permute.xlu1 %1362  ;;  %v1074_v39 = vpop.permute.xlu0 %1073 }
 0x1e7   : > { %v2962_v34 = vpop.permute.xlu1 %1061 }
 0x1eb   : > { %v836_v11 = vpop.permute.xlu1 %835 }
 0x1ec   : > { %v845_v43 = vsel %vm3635_vm7, %v2768_v30, %v836_v11  ;;  %v851_v54 = vsel %vm3635_vm7, %v836_v11, %v2768_v30  ;;  %v1005_v30 = vsel %vm2644_vm8, %v990_v49, 0.0  ;;  %vm3737_vm7 = vmmov %vm3736_vm11 }
 0x1ed   : > { %v860_v22 = vsel %vm2612_vm3, %v851_v54, 0.0  ;;  %v861_v31 = vsel %vm2623_vm5, %v845_v43, 0.0  ;;  %v1041_v21 = vmul.f32 %v3729_v27, %v1005_v30  ;;  %v3733_v54 = vld [vmem:[#allocation21_spill] sm:$0xff] }
 0x1ee   : > { %v896_v52 = vmul.f32 %v3724_v35, %v860_v22  ;;  %v897_v0 = vmul.f32 %v3724_v35, %v861_v31  ;;  %v1237_v1 = vmul.f32 %v3733_v54, %v1186_v7  ;;  %v1238_v22 = vmul.f32 %v3733_v54, %v1202_v13  ;;  %v1268_v31 = vpop.permute.xlu0 %1267 }
 0x1ef   : > { %v1078_v40 = vpop.permute.xlu1 %1077  ;;  %v905_v35 = vadd.f32 %v893_v18, %v808_v63 }
 0x1f0   : > { %v908_v16 = vadd.f32 %v896_v52, %v811_v41  ;;  %v909_v47 = vadd.f32 %v897_v0, %v812_v2  ;;  %v1087_v4 = vsel %vm3725_vm2, %v2806_v37, %v1078_v40  ;;  %v1093_v62 = vsel %vm3726_vm15, %v1078_v40, %v2806_v37  ;;  %v3734_v52 = vld [vmem:[#allocation15_spill] sm:$0xff] }
 0x1f1   : > { %v1104_v23 = vsel %vm2612_vm3, %v1087_v4, 0.0  ;;  %v1105_v10 = vsel %vm2703_vm0, %v1093_v62, 0.0  ;;  %vm3731_vm2 = vcmp.lt.s32.totalorder %v2601_v3, 111  ;;  %v904_v41 = vadd.f32 %v892_v14, %v807_v24 }
 0x1f2   : > { %v956_v9 = vadd.f32 %v2883_v42, %v908_v16  ;;  %v957_v37 = vadd.f32 %v2887_v55, %v909_v47  ;;  %v1140_v61 = vmul.f32 %v3730_v17, %v1104_v23  ;;  %v1141_v19 = vmul.f32 %v3730_v17, %v1105_v10  ;;  %vm3732_vm15 = vmmov %vm3731_vm2  ;;  %v3739_v23 = vld [vmem:[#allocation16_spill] sm:$0xff]  ;;  %v3740_v10 = vld [vmem:[#allocation26_spill] sm:$0xff] }
 0x1f3   : > { %v1274_v46 = vpop.permute.xlu1 %1273  ;;  %v1085_v4 = vsel %vm3736_vm11, %v2962_v34, %v1074_v39  ;;  %v1091_v14 = vsel %vm3737_vm7, %v1074_v39, %v2962_v34  ;;  %v940_v27 = vmul.f32 %v3740_v10, %v3739_v23  ;;  %v1002_v34 = vsel %vm2648_vm9, %v994_v38, 0.0  ;;  %vm3745_vm7 = vmmov %vm3731_vm2 }
 0x1f4   : > { %v1053_v11 = vadd.f32 %v1041_v21, %v956_v9  ;;  %v1054_v49 = vadd.f32 %v1042_v56, %v957_v37  ;;  %v1283_v42 = vsel %vm3731_vm2, %v2828_v53, %v1274_v46  ;;  %v1289_v55 = vsel %vm3732_vm15, %v1274_v46, %v2828_v53  ;;  %vm3735_vm15 = vmmov %vm3731_vm2  ;;  %v3741_v21 = vld [vmem:[#allocation18_spill] sm:$0xff]  ;;  %v1173_v9 = vpop.permute.xlu0 %1172 }
 0x1f5   : > { %v1300_v51 = vsel %vm2644_vm8, %v1283_v42, 0.0  ;;  %v1301_v43 = vsel %vm2724_vm14, %v1289_v55, 0.0  ;;  %v941_v56 = vmul.f32 %v3740_v10, %v3741_v21  ;;  %v1100_v46 = vsel %vm2612_vm3, %v1085_v4, 0.0 }
 0x1f6   : > { %v1152_v53 = vadd.f32 %v1140_v61, %v1053_v11  ;;  %v1153_v2 = vadd.f32 %v1141_v19, %v1054_v49  ;;  %v1336_v0 = vmul.f32 %v3734_v52, %v1300_v51  ;;  %v1337_v30 = vmul.f32 %v3734_v52, %v1301_v43  ;;  %v3742_v61 = vld [vmem:[#allocation11_spill] sm:$0xff] }
 0x1f7   : > { %v1256_v26 = vpop.permute.xlu1 %1255  ;;  %v1037_v19 = vmul.f32 %v3742_v61, %v1001_v15  ;;  %v1101_v11 = vsel %vm2703_vm0, %v1091_v14, 0.0  ;;  %v952_v42 = vadd.f32 %v940_v27, %v904_v41  ;;  %v953_v55 = vadd.f32 %v941_v56, %v905_v35 }
 0x1f8   : > { %v1249_v57 = vadd.f32 %v1237_v1, %v1152_v53  ;;  %v1250_v40 = vadd.f32 %v1238_v22, %v1153_v2  ;;  %v1280_v16 = vsel %vm3731_vm2, %v1256_v26, %v1268_v31  ;;  %v1286_v47 = vsel %vm3735_vm15, %v1268_v31, %v1256_v26  ;;  %v3743_v1 = vld [vmem:[#allocation29_spill] sm:$0xff]  ;;  %v1258_v26 = vpop.permute.xlu0 %1257 }
 0x1f9   : > { %v1294_v18 = vsel %vm2644_vm8, %v1280_v16, 0.0  ;;  %v1295_v24 = vsel %vm2724_vm14, %v1286_v47, 0.0  ;;  %v1038_v54 = vmul.f32 %v3742_v61, %v1002_v34  ;;  %v1136_v22 = vmul.f32 %v3743_v1, %v1100_v46  ;;  %v486_v61 = vpop.f32.mrb[8].mxu0  ;;  %v3144_v46 = vld [vmem:[%s3574_s3 + $0x20] sm:$0xff] }
 0x1fa   : > { %v1348_v62 = vadd.f32 %v1336_v0, %v1249_v57  ;;  %v1349_v63 = vadd.f32 %v1337_v30, %v1250_v40  ;;  %v1330_v32 = vmul.f32 %v3738_v59, %v1294_v18  ;;  %v1331_v58 = vmul.f32 %v3738_v59, %v1295_v24  ;;  %v3744_v0 = vld [vmem:[#allocation14_spill] sm:$0xff]  ;;  %v3746_v59 = vld [vmem:[#allocation19_spill] sm:$0xff] }
 0x1fb   : > { %v1161_v39 = vpop.permute.xlu1 %1160  ;;  %v1137_v31 = vmul.f32 %v3743_v1, %v1101_v11  ;;  %v1049_v35 = vadd.f32 %v1037_v19, %v952_v42  ;;  %v1050_v52 = vadd.f32 %v1038_v54, %v953_v55  ;;  %v488_v19 = vpop.f32.mrb[9].mxu0  ;;  %v1546_v42 = vld [vmem:[%s3576_s5 + $0x8] sm:$0xff]  ;;  %v3747_v55 = vmov 1  }
 0x1fc   : > { %v3077_v37 = vadd.f32 %v2878_v5, %v1348_v62  ;;  %v3080_v7 = vadd.f32 %v2878_v5, %v1349_v63  ;;  %v1342_v13 = vadd.f32 %v1330_v32, %v2970_v12  ;;  %v1343_v17 = vadd.f32 %v1331_v58, %v2972_v6  ;;  %v492_v11 = vpop.f32.mrb[10].mxu0 }
 0x1fd   : > { %v1190_v49 = vsel %vm1182_vm10, %v1173_v9, %v1161_v39  ;;  %v1184_v6 = vsel %vm1182_vm10, %v1161_v39, %v1173_v9  ;;  %v1148_v16 = vadd.f32 %v1136_v22, %v1049_v35  ;;  %v1149_v47 = vadd.f32 %v1137_v31, %v1050_v52  ;;  %v1545_v9 = vld [vmem:[%s3576_s5] sm:$0xff] }
 0x1fe   : > { %v1408_v5 = vmul.f32 %v3077_v37, %v3077_v37  ;;  %v1409_v12 = vmul.f32 %v3080_v7, %v3080_v7  ;;  %v1198_v38 = vsel %vm505_vm12, %v1190_v49, 0.0  ;;  %v3100_v51 = vadd.f32 %v2924_v33, %v1342_v13  ;;  %v345_v13 = vld [vmem:[%s3573_s2 + $0x20] sm:$0xff]  ;;  %v494_v49 = vpop.f32.mrb[11].mxu0 }
 0x1ff   : > { %v1368_v15 = vpop.permute.xlu1 %1367  ;;  %v3103_v43 = vadd.f32 %v2924_v33, %v1343_v17  ;;  %v1233_v30 = vmul.f32 %v3744_v0, %v1184_v6  ;;  %v1234_v33 = vmul.f32 %v3744_v0, %v1198_v38  ;;  %v346_v17 = vld [vmem:[%s3573_s2 + $0x28] sm:$0xff]  ;;  %v3749_v6 = vmov 2  }
 0x200   : > { %v1419_v53 = vadd.f32 %v1409_v12, %v1408_v5  ;;  %v1402_v2 = vmul.f32 %v3100_v51, %v3100_v51  ;;  %v3155_v5 = vld [vmem:[%s3574_s3 + $0x28] sm:$0xff]  ;;  %v3748_v12 = vmov 4   ;;  %v3750_v38 = vmov 3  }
 0x201   : > { %v1403_v41 = vmul.f32 %v3103_v43, %v3103_v43  ;;  %v1245_v62 = vadd.f32 %v1233_v30, %v1148_v16  ;;  %v1246_v63 = vadd.f32 %v1234_v33, %v1149_v47 }
 0x202   : > { %1420 = vadd.xlane.f32.xlu1 %v1419_v53 }
 0x203   : > { %v1270_v57 = vpop.permute.xlu1 %1269  ;;  %v1410_v40 = vadd.f32 %v1403_v41, %v1402_v2 }
 0x204   : > { %v1281_v4 = vsel %vm3745_vm7, %v1258_v26, %v1270_v57  ;;  %v1287_v14 = vsel %vm3731_vm2, %v1270_v57, %v1258_v26 }
 0x205   : > { %v1296_v18 = vsel %vm2644_vm8, %v1281_v4, 0.0  ;;  %v1297_v24 = vsel %vm2724_vm14, %v1287_v14, 0.0  ;;  %1411 = vadd.xlane.f32.xlu0 %v1410_v40 }
 0x206   : > { %v1332_v32 = vmul.f32 %v3746_v59, %v1296_v18  ;;  %v1333_v58 = vmul.f32 %v3746_v59, %v1297_v24 }
 0x208   : > { %v1344_v23 = vadd.f32 %v1332_v32, %v1245_v62  ;;  %v1345_v10 = vadd.f32 %v1333_v58, %v1246_v63 }
 0x20a   : > { %v3124_v27 = vadd.f32 %v1368_v15, %v1344_v23  ;;  %v3126_v21 = vadd.f32 %v1368_v15, %v1345_v10 }
 0x20c   : > { %v1404_v56 = vmul.f32 %v3124_v27, %v3124_v27  ;;  %v1405_v34 = vmul.f32 %v3126_v21, %v3126_v21 }
 0x20e   : > { %v1413_v39 = vadd.f32 %v1405_v34, %v1404_v56 }
 0x210   : > { %1414 = vadd.xlane.f32.xlu0 %v1413_v39 }
 0x213   : > { %1549 = vperm.xlu1 %1974, %v1545_v9  }
 0x217   : > { %369 = vperm.xlu1 %1974, %v345_v13  }
 0x21b   : > { %374 = vperm.xlu1 %1974, %v346_v17  }
 0x21f   : > { %589 = vperm.xlu1 %1974, %v3144_v46  }
 0x223   : > { %1975 = vset.pattern.permute.xlu1 %v3747_v55 }
 0x224   : > { %687 = vperm.xlu1 %1975, %v3144_v46  }
 0x226   : > { %1554 = vperm.xlu0 %1973, %v1546_v42  }
 0x228   : > { %691 = vperm.xlu1 %1975, %v3155_v5  }
 0x22a   : > { %1978 = vset.pattern.permute.xlu0 %v3748_v12 }
 0x22c   : > { %1976 = vset.pattern.permute.xlu1 %v3749_v6 }
 0x22d   : > { %786 = vperm.xlu1 %1976, %v3144_v46  }
 0x231   : > { %790 = vperm.xlu1 %1976, %v3155_v5  }
 0x235   : > { %1977 = vset.pattern.permute.xlu1 %v3750_v38 }
 0x236   : > { %883 = vperm.xlu1 %1977, %v3144_v46  }
 0x23a   : > { %887 = vperm.xlu1 %1977, %v3155_v5  }
 0x23e   : > { %1979 = vset.pattern.permute.xlu1 %v3748_v12 }
 0x255   : > { %v1418_v15 = vpop.xlane.xlu0 %1417 }
 0x256   : > { %1987 = vrsqrt.f32 %v1418_v15  ;;  %vm1438_vm15 = vcmp.eq.f32.partialorder %v1418_v15, inf  ;;  %v1441_v41 = vand.u32 2147483648, %v1418_v15  ;;  %vm1440_vm11 = vcmp.eq.f32.partialorder %v1418_v15, 0.0 }
 0x260   : > { %v1988_v54 = vpop.eup %1987 }
 0x261   : > { %v1437_v22 = vmul.f32 %v1988_v54, %v1418_v15  ;;  %v3751_v54 = vmov 5  }
 0x263   : > { %v1439_v2 = vsel %vm1438_vm15, %v1418_v15, %v1437_v22 }
 0x264   : > { %v1442_v0 = vsel %vm1440_vm11, %v1441_v41, %v1439_v2 }
 0x265   : > { %v1452_v57 = vmax.f32 %v1442_v0, 1e-12 }
 0x28f   : > { %v1421_v1 = vpop.xlane.xlu1 %1420 }
 0x290   : > { %1989 = vrsqrt.f32 %v1421_v1  ;;  %vm1445_vm7 = vcmp.eq.f32.partialorder %v1421_v1, inf  ;;  %v1448_v14 = vand.u32 2147483648, %v1421_v1  ;;  %vm1447_vm2 = vcmp.eq.f32.partialorder %v1421_v1, 0.0 }
 0x292   : > { %v1412_v31 = vpop.xlane.xlu0 %1411 }
 0x293   : > { %1991 = vrsqrt.f32 %v1412_v31  ;;  %v3166_v53 = vpop.permute.xlu1 %1549  ;;  %vm1424_vm15 = vcmp.eq.f32.partialorder %v1412_v31, inf  ;;  %v1427_v62 = vand.u32 2147483648, %v1412_v31  ;;  %vm1426_vm11 = vcmp.eq.f32.partialorder %v1412_v31, 0.0 }
 0x297   : > { %v370_v35 = vpop.permute.xlu1 %369 }
 0x298   : > { %v3168_v52 = vadd.f32 %v486_v61, %v370_v35  ;;  %v3172_v40 = vadd.f32 %v488_v19, %v370_v35 }
 0x29a   : > { %v1990_v30 = vpop.eup %1989  ;;  %524 = vrot.lane.b32.xlu0 %v3168_v52, %s2086_s29 }
 0x29b   : > { %v1444_v33 = vmul.f32 %v1990_v30, %v1421_v1  ;;  %v375_v26 = vpop.permute.xlu1 %374 }
 0x29c   : > { %v3174_v16 = vadd.f32 %v492_v11, %v375_v26  ;;  %v3180_v32 = vadd.f32 %v494_v49, %v375_v26 }
 0x29d   : > { %v1992_v47 = vpop.eup %1991  ;;  %v1446_v4 = vsel %vm1445_vm7, %v1421_v1, %v1444_v33  ;;  %v1415_v18 = vpop.xlane.xlu0 %1414  ;;  %v3753_v1 = vmov 0.0  }
 0x29e   : > { %v1423_v24 = vmul.f32 %v1992_v47, %v1412_v31  ;;  %1993 = vrsqrt.f32 %v1415_v18  ;;  %526 = vrot.lane.b32.xlu1 %v3174_v16, %s2086_s29  ;;  %536 = vrot.lane.b32.xlu0 %v3172_v40, %s2086_s29  ;;  %v1449_v63 = vsel %vm1447_vm2, %v1448_v14, %v1446_v4  ;;  %vm1431_vm7 = vcmp.eq.f32.partialorder %v1415_v18, inf }
 0x29f   : > { %1995 = vrcp.f32 %v1452_v57  ;;  %v1453_v58 = vmax.f32 %v1449_v63, 1e-12  ;;  %v1434_v9 = vand.u32 2147483648, %v1415_v18  ;;  %vm1433_vm2 = vcmp.eq.f32.partialorder %v1415_v18, 0.0 }
 0x2a0   : > { %v1425_v59 = vsel %vm1424_vm15, %v1412_v31, %v1423_v24  ;;  %vm3756_vm15 = vcmp.ge.s32.totalorder %v2601_v3, 16 }
 0x2a1   : > { %v1428_v23 = vsel %vm1426_vm11, %v1427_v62, %v1425_v59  ;;  %1997 = vrcp.f32 %v1453_v58 }
 0x2a2   : > { %538 = vrot.lane.b32.xlu1 %v3180_v32, %s2086_s29  ;;  %629 = vrot.lane.b32.xlu0 %v3168_v52, %s2088_s16  ;;  %v1450_v10 = vmax.f32 %v1428_v23, 1e-12 }
 0x2a4   : > { %1999 = vrcp.f32 %v1450_v10 }
 0x2a5   : > { %v3232_v0 = vpop.permute.xlu0 %1554 }
 0x2a6   : > { %631 = vrot.lane.b32.xlu1 %v3174_v16, %s2088_s16  ;;  %641 = vrot.lane.b32.xlu0 %v3172_v40, %s2088_s16 }
 0x2a8   : > { %v1994_v56 = vpop.eup %1993 }
 0x2a9   : > { %v1996_v34 = vpop.eup %1995  ;;  %v1430_v39 = vmul.f32 %v1994_v56, %v1415_v18 }
 0x2aa   : > { %643 = vrot.lane.b32.xlu1 %v3180_v32, %s2088_s16  ;;  %931 = vperm.xlu0 %1978, %v3144_v46   ;;  %v1467_v19 = vmul.f32 %v1996_v34, %v2759_v60  ;;  %v1466_v42 = vmul.f32 %v1996_v34, %v2762_v48  ;;  %v3752_v60 = vmov 8  }
 0x2ab   : > { %v1432_v13 = vsel %vm1431_vm7, %v1415_v18, %v1430_v39  ;;  %v1998_v17 = vpop.eup %1997 }
 0x2ac   : > { %v1435_v61 = vsel %vm1433_vm2, %v1434_v9, %v1432_v13  ;;  %v1469_v49 = vmul.f32 %v1998_v17, %v3080_v7  ;;  %v1468_v55 = vmul.f32 %v1998_v17, %v3077_v37  ;;  %vm3761_vm2 = vcmp.lt.s32.totalorder %v2601_v3, 1 }
 0x2ad   : > { %v1451_v11 = vmax.f32 %v1435_v61, 1e-12 }
 0x2ae   : > { %v2000_v12 = vpop.eup %1999  ;;  %935 = vperm.xlu1 %1979, %v3155_v5   ;;  %726 = vrot.lane.b32.xlu0 %v3168_v52, %s2085_s28  ;;  %v1873_v6 = vpack.c.bf16 %v1469_v49, %v1467_v19  ;;  %v1875_v15 = vpack.c.bf16 %v1468_v55, %v1466_v42 }
 0x2af   : > { %2001 = vrcp.f32 %v1451_v11  ;;  %v1463_v38 = vmul.f32 %v2000_v12, %v3103_v43  ;;  %1980 = vset.pattern.permute.xlu0 %v3751_v54  ;;  %v1462_v48 = vmul.f32 %v2000_v12, %v3100_v51  ;;  %v3754_v51 = vmov 6  }
 0x2b0   : > { %1874 = vmatprep.subr.bf16.mxu1 %v1873_v6 }
 0x2b1   : > { %1534 = vmatprep.mubr.f32.mxu1 %v1463_v38  ;;  %1876 = vmatpush1.bf16.xpose.msra.mxu1 %v1875_v15 }
 0x2b2   : > { %837 = vrot.lane.b32.xlu1 %v3172_v40, %s2089_s17  ;;  %728 = vrot.lane.b32.xlu0 %v3174_v16, %s2085_s28 }
 0x2b3   : > { %1985 = vset.pattern.permute.xlu1 %v3752_v60 }
 0x2b6   : > { %738 = vrot.lane.b32.xlu0 %v3172_v40, %s2085_s28 }
 0x2b8   : > { %1535 = vmatmul.mubr.f32.vlgmr.msra.gmra.mrb[0].mxu1 %v1462_v48 }
 0x2b9   : > { %v2002_v37 = vpop.eup %2001 }
 0x2ba   : > { %v1465_v7 = vmul.f32 %v2002_v37, %v3126_v21  ;;  %v1464_v43 = vmul.f32 %v2002_v37, %v3124_v27  ;;  %740 = vrot.lane.b32.xlu0 %v3180_v32, %s2085_s28  ;;  %v3755_v27 = vmov 7   ;;  %v590_v21 = vpop.permute.xlu1 %589 }
 0x2bc   : > { %1539 = vmatprep.mubr.f32.mxu1 %v1465_v7 }
 0x2bd   : > { %1540 = vmatmul.mubr.f32.gmra.mrb[2].mxu1 %v1464_v43 }
 0x2be   : > { %1655 = vmatprep.mubr.f32.mxu1 %v3753_v1  ;;  %1028 = vperm.xlu0 %1980, %v3144_v46   ;;  %v688_v22 = vpop.permute.xlu1 %687 }
 0x2c2   : > { %1032 = vperm.xlu0 %1980, %v3155_v5   ;;  %v3228_v31 = vpop.permute.xlu1 %691 }
 0x2c6   : > { %825 = vrot.lane.b32.xlu0 %v3168_v52, %s2089_s17  ;;  %v787_v2 = vpop.permute.xlu1 %786 }
 0x2c7   : > { %1981 = vset.pattern.permute.xlu0 %v3754_v51 }
 0x2ca   : > { %827 = vrot.lane.b32.xlu0 %v3174_v16, %s2089_s17  ;;  %v3230_v41 = vpop.permute.xlu1 %790 }
 0x2ce   : > { %839 = vrot.lane.b32.xlu0 %v3180_v32, %s2089_s17  ;;  %v884_v35 = vpop.permute.xlu1 %883 }
 0x2d2   : > { %1127 = vperm.xlu0 %1981, %v3144_v46   ;;  %v3234_v30 = vpop.permute.xlu1 %887 }
 0x2d6   : > { %1131 = vperm.xlu0 %1981, %v3155_v5  }
 0x2da   : > { %1982 = vset.pattern.permute.xlu0 %v3755_v27 }
 0x2db   : > { %1224 = vperm.xlu0 %1982, %v3144_v46  }
 0x30c   : > { %v525_v33 = vpop.permute.xlu0 %524 }
 0x310   : > { %v527_v26 = vpop.permute.xlu1 %526  ;;  %v537_v57 = vpop.permute.xlu0 %536 }
 0x311   : > { %v545_v47 = vsel %vm540_vm1, %v525_v33, %v537_v57  ;;  %v551_v4 = vsel %vm540_vm1, %v537_v57, %v525_v33 }
 0x312   : > { %v564_v63 = vsel %vm2623_vm5, %v545_v47, 0.0  ;;  %v563_v59 = vsel %vm2635_vm6, %v551_v4, 0.0 }
 0x313   : > { %v606_v34 = vmul.f32 %v590_v21, %v564_v63  ;;  %v605_v13 = vmul.f32 %v590_v21, %v563_v59 }
 0x314   : > { %v539_v14 = vpop.permute.xlu1 %538  ;;  %v630_v18 = vpop.permute.xlu0 %629 }
 0x315   : > { %v3242_v24 = vsel %vm540_vm1, %v527_v26, %v539_v14  ;;  %v3246_v62 = vsel %vm540_vm1, %v539_v14, %v527_v26  ;;  %vm3757_vm1 = vcmp.lt.s32.totalorder %v2601_v3, 15 }
 0x316   : > { %vm3758_vm11 = vmmov %vm3757_vm1 }
 0x317   : > { %vm3760_vm7 = vmmov %vm3757_vm1 }
 0x318   : > { %v632_v58 = vpop.permute.xlu1 %631  ;;  %v642_v23 = vpop.permute.xlu0 %641 }
 0x319   : > { %v650_v10 = vsel %vm645_vm4, %v630_v18, %v642_v23  ;;  %v656_v56 = vsel %vm645_vm4, %v642_v23, %v630_v18 }
 0x31a   : > { %v666_v39 = vsel %vm3756_vm15, %v656_v56, 0.0  ;;  %v703_v9 = vmul.f32 %v688_v22, %v650_v10  ;;  %vm3762_vm15 = vmmov %vm3761_vm2 }
 0x31b   : > { %v702_v17 = vmul.f32 %v688_v22, %v666_v39 }
 0x31c   : > { %v715_v61 = vadd.f32 %v703_v9, %v606_v34  ;;  %v644_v19 = vpop.permute.xlu1 %643 }
 0x31d   : > { %v714_v11 = vadd.f32 %v702_v17, %v605_v13  ;;  %v3260_v49 = vsel %vm645_vm4, %v632_v58, %v644_v19  ;;  %v3264_v42 = vsel %vm645_vm4, %v644_v19, %v632_v58  ;;  %vm3759_vm4 = vmmov %vm3757_vm1 }
 0x329   : > { %v932_v55 = vpop.permute.xlu0 %931 }
 0x32a   : > { %v946_v56 = vmul.f32 %v932_v55, %v3168_v52  ;;  %v947_v34 = vmul.f32 %v932_v55, %v3172_v40  ;;  %v1559_v55 = vld [vmem:[%s3577_s6] sm:$0xff] }
 0x32d   : > { %v727_v12 = vpop.permute.xlu0 %726  ;;  %v3284_v57 = vpop.permute.xlu1 %935 }
 0x32e   : > { %v948_v25 = vmul.f32 %v3284_v57, %v3174_v16 }
 0x331   : > { %v729_v6 = vpop.permute.xlu0 %728  ;;  %v838_v4 = vpop.permute.xlu1 %837 }
 0x335   : > { %v739_v38 = vpop.permute.xlu0 %738 }
 0x336   : > { %v747_v15 = vsel %vm3757_vm1, %v727_v12, %v739_v38  ;;  %v753_v54 = vsel %vm3758_vm11, %v739_v38, %v727_v12  ;;  %vm3763_vm1 = vmmov %vm3761_vm2 }
 0x337   : > { %v765_v48 = vsel %vm2670_vm13, %v753_v54, 0.0  ;;  %v766_v37 = vsel %vm2648_vm9, %v747_v15, 0.0  ;;  %vm3764_vm11 = vmmov %vm3763_vm1  ;;  %v1560_v54 = vld [vmem:[%s3577_s6 + $0x8] sm:$0xff] }
 0x338   : > { %v801_v7 = vmul.f32 %v787_v2, %v765_v48  ;;  %v802_v43 = vmul.f32 %v787_v2, %v766_v37 }
 0x339   : > { %v741_v51 = vpop.permute.xlu0 %740 }
 0x33a   : > { %v813_v27 = vadd.f32 %v801_v7, %v714_v11  ;;  %v814_v21 = vadd.f32 %v802_v43, %v715_v61  ;;  %v3276_v22 = vsel %vm3759_vm4, %v729_v6, %v741_v51  ;;  %v3280_v33 = vsel %vm3760_vm7, %v741_v51, %v729_v6 }
 0x33b   : > { %vm3765_vm4 = vcmask 130048  }
 0x33c   : > { %vm3766_vm7 = vmmov %vm3765_vm4 }
 0x33d   : > { %v3282_v26 = vpop.permute.xlu0 %1028 }
 0x341   : > { %v3286_v47 = vpop.permute.xlu0 %1032 }
 0x345   : > { %v826_v14 = vpop.permute.xlu0 %825 }
 0x346   : > { %v846_v2 = vsel %vm3761_vm2, %v826_v14, %v838_v4  ;;  %v852_v18 = vsel %vm3762_vm15, %v838_v4, %v826_v14  ;;  %vm3772_vm2 = vmmov %vm3765_vm4 }
 0x347   : > { %v862_v63 = vsel %vm2612_vm3, %v852_v18, 0.0  ;;  %v863_v59 = vsel %vm2623_vm5, %v846_v2, 0.0  ;;  %vm3773_vm15 = vmmov %vm3772_vm2 }
 0x348   : > { %v898_v58 = vmul.f32 %v884_v35, %v862_v63  ;;  %v899_v23 = vmul.f32 %v884_v35, %v863_v59 }
 0x349   : > { %v828_v10 = vpop.permute.xlu0 %827 }
 0x34a   : > { %v910_v39 = vadd.f32 %v898_v58, %v813_v27  ;;  %v911_v9 = vadd.f32 %v899_v23, %v814_v21 }
 0x34c   : > { %v3298_v13 = vadd.f32 %v946_v56, %v910_v39  ;;  %v3300_v17 = vadd.f32 %v947_v34, %v911_v9 }
 0x34d   : > { %v840_v61 = vpop.permute.xlu0 %839 }
 0x34e   : > { %v3304_v19 = vsel %vm3763_vm1, %v828_v10, %v840_v61  ;;  %v3308_v11 = vsel %vm3764_vm11, %v840_v61, %v828_v10  ;;  %vm3774_vm1 = vcmp.ge.s32.totalorder %v2601_v3, 16 }
 0x34f   : > { %v864_v36 = vsel %vm2612_vm3, %v3308_v11, 0.0 }
 0x38b   : > { %v1536_v35 = vpop.f32.mrb[0].mxu1 }
 0x38c   : > { %v1557_v12 = vmul.f32 %v3166_v53, %v1536_v35  ;;  %v1538_v6 = vpop.f32.mrb[1].mxu1  ;;  %v3768_v53 = vmov 0  }
 0x38d   : > { %v768_v6 = vsel %vm2648_vm9, %v3276_v22, 0.0 }
 0x38e   : > { %v1561_v38 = vadd.f32 %v1559_v55, %v1557_v12  ;;  %v668_v55 = vsel %vm3774_vm1, %v3264_v42, 0.0  ;;  %v767_v12 = vsel %vm2670_vm13, %v3280_v33, 0.0  ;;  %v705_v42 = vmul.f32 %v3228_v31, %v3260_v49 }
 0x38f   : > { %v803_v22 = vmul.f32 %v3230_v41, %v767_v12  ;;  %vm3777_vm13 = vcmp.lt.s32.totalorder %v2601_v3, 113 }
 0x390   : > { %v1541_v15 = vpop.f32.mrb[2].mxu1  ;;  %v1563_v37 = vsel %vm3765_vm4, %v1561_v38, -inf  ;;  %vm3778_vm11 = vmmov %vm3777_vm13 }
 0x391   : > { %v1558_v48 = vmul.f32 %v3232_v0, %v1541_v15  ;;  %v1543_v7 = vpop.f32.mrb[3].mxu1  ;;  %1564 = vmax.xlane.f32.xlu1 %v1563_v37  ;;  %v1359_v0 = vld [vmem:[%s3575_s4 + $0x28] sm:$0xff]  ;;  %v566_v15 = vsel %vm2623_vm5, %v3242_v24, 0.0  ;;  %v1670_v24 = vld [vmem:[%s3579_s8] sm:$0xff] }
 0x393   : > { %v1562_v43 = vadd.f32 %v1560_v54, %v1558_v48  ;;  %v704_v48 = vmul.f32 %v3228_v31, %v668_v55  ;;  %v804_v31 = vmul.f32 %v3230_v41, %v768_v6 }
 0x395   : > { %v1566_v51 = vsel %vm3766_vm7, %v1562_v43, -inf }
 0x396   : > { %1567 = vmax.xlane.f32.xlu0 %v1566_v51 }
 0x3a2   : > { %1327 = vperm.xlu1 %1985, %v3155_v5  }
 0x3a6   : > { %1168 = vrot.lane.b32.xlu1 %v3174_v16, %s3767_s21 }
 0x3a7   : > { %1986 = vset.pattern.permute.xlu1 %v3768_v53 }
 0x3aa   : > { %1180 = vrot.lane.b32.xlu1 %v3180_v32, %s3767_s21 }
 0x3ac   : > { %1228 = vperm.xlu0 %1982, %v3155_v5  }
 0x3ae   : > { %1387 = vperm.xlu1 %1986, %v1359_v0  }
 0x3b0   : > { %970 = vrot.lane.b32.xlu0 %v3168_v52, %s3769_s26 }
 0x3b1   : > { %1983 = vset.pattern.permute.xlu0 %v3752_v60 }
 0x3b2   : > { %1263 = vrot.lane.b32.xlu1 %v3168_v52, %s3770_s27 }
 0x3b4   : > { %972 = vrot.lane.b32.xlu0 %v3174_v16, %s3769_s26 }
 0x3b8   : > { %982 = vrot.lane.b32.xlu0 %v3172_v40, %s3769_s26 }
 0x3bc   : > { %984 = vrot.lane.b32.xlu0 %v3180_v32, %s3769_s26  ;;  %s2093_s26 = smov [#allocation2]  }
 0x3c0   : > { %1323 = vperm.xlu0 %1983, %v3144_v46   ;;  %v1358_v46 = vld [vmem:[%s3575_s4 + $0x20] sm:$0xff] }
 0x3c4   : > { %1984 = vset.pattern.permute.xlu0 %v3768_v53 }
 0x3c5   : > { %594 = vperm.xlu0 %1984, %v3155_v5   ;;  %v1671_v5 = vld [vmem:[%s3579_s8 + $0x8] sm:$0xff] }
 0x3c9   : > { %1067 = vrot.lane.b32.xlu0 %v3168_v52, %s3771_s22 }
 0x3cd   : > { %1069 = vrot.lane.b32.xlu0 %v3174_v16, %s3771_s22 }
 0x3d1   : > { %1079 = vrot.lane.b32.xlu0 %v3172_v40, %s3771_s22 }
 0x3d5   : > { %1081 = vrot.lane.b32.xlu0 %v3180_v32, %s3771_s22  ;;  %s323_s22 = sand.u32 1, %s2065_s10  }
 0x3d6   : > { %s1849_s23 = sshll.u32 %s323_s22, 5  ;;  %s3529_s25 = scalar_lea.sflag [#allocation3], %s323_s22 }
 0x3d7   : > { %s325_s28 = scalar_lea.vmem [#allocation2], %s1849_s23 }
 0x3d8   : > { %s1783_s29 = sshll.u32 %s325_s28, 4  ;;  %s3522_s29 = int_to_ptr.vmem [resolvable:$true] %s1783_s29 }
 0x3d9   : > { %1166 = vrot.lane.b32.xlu0 %v3168_v52, %s3767_s21  ;;  %v3366_v52 = vpop.permute.xlu0 %1127  ;;  %s2011_s13 = scalar_lea.vmem %s3522_s29, 512 }
 0x3da   : > { %p2012_p11 = scmp.ne.s32.totalorder %s3522_s29, %s2011_s13 }
 0x3dc   : > { %p2013_p12 = pnand %p2012_p11, %p2183_p5 }
 0x3dd   : > { %1178 = vrot.lane.b32.xlu0 %v3172_v40, %s3767_s21  ;;  %v3368_v60 = vpop.permute.xlu0 %1131 }
 0x3de   : > { %p2014_p13 = pneg %p2013_p12 }
 0x3e1   : > { %1382 = vperm.xlu0 %1984, %v1358_v46   ;;  %v3370_v27 = vpop.permute.xlu0 %1224 }
 0x3e5   : > { %1265 = vrot.lane.b32.xlu0 %v3174_v16, %s3770_s27 }
 0x3e9   : > { %1277 = vrot.lane.b32.xlu0 %v3180_v32, %s3770_s27 }
 0x3ed   : > { %1679 = vperm.xlu0 %1984, %v1671_v5  }
 0x41e   : > { %v1565_v21 = vpop.xlane.xlu1 %1564 }
 0x41f   : > { %v1569_v4 = vsub.f32 %v1561_v38, %v1565_v21  ;;  %v565_v38 = vsel %vm2635_vm6, %v3246_v62, 0.0  ;;  %v865_v62 = vsel %vm2623_vm5, %v3304_v19, 0.0  ;;  %v949_v19 = vmul.f32 %v3284_v57, %v3180_v32 }
 0x420   : > { %vm3775_vm5 = vcmp.lt.s32.totalorder %v2601_v3, 127 }
 0x421   : > { %v1571_v14 = vmul.f32 1.442695, %v1569_v4  ;;  %vm3776_vm6 = vmmov %vm3775_vm5 }
 0x422   : > { %vm3779_vm4 = vmmov %vm3775_vm5 }
 0x423   : > { %v1568_v2 = vpop.xlane.xlu0 %1567  ;;  %2003 = vpow2.f32 %v1571_v14  ;;  %vm3780_vm7 = vmmov %vm3779_vm4 }
 0x424   : > { %v1570_v18 = vsub.f32 %v1562_v43, %v1568_v2  ;;  %v901_v43 = vmul.f32 %v3234_v30, %v865_v62 }
 0x426   : > { %v1573_v63 = vmul.f32 1.442695, %v1570_v18 }
 0x428   : > { %2005 = vpow2.f32 %v1573_v63 }
 0x42b   : > { %v3372_v59 = vpop.permute.xlu0 %1228 }
 0x42d   : > { %v3374_v58 = vpop.eup %2003 }
 0x42e   : > { %v1575_v23 = vsel %vm3772_vm2, %v3374_v58, 0.0  ;;  %vm3781_vm2 = vmmov %vm3778_vm11 }
 0x42f   : > { %v971_v10 = vpop.permute.xlu0 %970  ;;  %1576 = vadd.xlane.f32.xlu1 %v1575_v23 }
 0x432   : > { %v3378_v56 = vpop.eup %2005 }
 0x433   : > { %v3380_v34 = vpop.permute.xlu0 %972  ;;  %v1578_v39 = vsel %vm3773_vm15, %v3378_v56, 0.0  ;;  %vm3782_vm15 = vmmov %vm3781_vm2 }
 0x434   : > { %1579 = vadd.xlane.f32.xlu1 %v1578_v39 }
 0x437   : > { %v983_v9 = vpop.permute.xlu0 %982 }
 0x438   : > { %v991_v4 = vsel %vm3775_vm5, %v971_v10, %v983_v9 }
 0x439   : > { %v1007_v16 = vsel %vm2644_vm8, %v991_v4, 0.0 }
 0x43a   : > { %v1043_v63 = vmul.f32 %v3282_v26, %v1007_v16 }
 0x43b   : > { %v3384_v61 = vpop.permute.xlu0 %984 }
 0x43c   : > { %v1055_v12 = vadd.f32 %v1043_v63, %v3298_v13 }
 0x43f   : > { %v3386_v35 = vpop.permute.xlu0 %1323 }
 0x444   : > { %v595_v54 = vpop.permute.xlu0 %594 }
 0x445   : > { %v607_v28 = vmul.f32 %v595_v54, %v565_v38  ;;  %v608_v33 = vmul.f32 %v595_v54, %v566_v15  ;;  %1275 = vrot.lane.b32.xlu1 %v3172_v40, %s3770_s27  ;;  %v900_v40 = vmul.f32 %v3234_v30, %v864_v36  ;;  %v997_v30 = vsel %vm3776_vm6, %v983_v9, %v971_v10  ;;  %v1328_v36 = vpop.permute.xlu1 %1327  ;;  %s2015_s27 = sshll.u32 %s2093_s26, 4  ;;  %s2016_s27 = int_to_ptr.vmem [resolvable:$false] %s2015_s27 }
 0x446   : > { %v1008_v57 = vsel %vm2648_vm9, %v997_v30, 0.0  ;;  %s2017_s23 = scalar_lea.vmem %s2016_s27, 1024  ;;  %p2018_p0 = scmp.lt.s32.totalorder %s3522_s29, %s2016_s27 }
 0x447   : > { %v716_v49 = vadd.f32 %v704_v48, %v607_v28  ;;  %v717_v37 = vadd.f32 %v705_v42, %v608_v33  ;;  %v1044_v39 = vmul.f32 %v3282_v26, %v1008_v57  ;;  %p2019_p1 = scmp.lt.s32.totalorder %s2017_s23, %s2011_s13 }
 0x448   : > { %v1068_v7 = vpop.permute.xlu0 %1067 }
 0x449   : > { %v815_v11 = vadd.f32 %v803_v22, %v716_v49  ;;  %v816_v51 = vadd.f32 %v804_v31, %v717_v37  ;;  %1674 = vperm.xlu1 %1986, %v1670_v24   ;;  %v1056_v38 = vadd.f32 %v1044_v39, %v3300_v17  ;;  %v1169_v62 = vpop.permute.xlu1 %1168  ;;  %v992_v49 = vsel %vm3779_vm4, %v3380_v34, %v3384_v61  ;;  %p2020_p2 = por %p2019_p1, %p2018_p0 }
 0x44a   : > { %v998_v37 = vsel %vm3780_vm7, %v3384_v61, %v3380_v34 }
 0x44b   : > { %v912_v53 = vadd.f32 %v900_v40, %v815_v11  ;;  %v913_v0 = vadd.f32 %v901_v43, %v816_v51  ;;  %v1009_v43 = vsel %vm2644_vm8, %v992_v49, 0.0  ;;  %v1010_v11 = vsel %vm2648_vm9, %v998_v37, 0.0  ;;  %p2021_p3 = pnand %p2020_p2, %p2014_p13 }
 0x44c   : > { %v1070_v46 = vpop.permute.xlu0 %1069  ;;  %vm3783_vm9 = vcmp.lt.s32.totalorder %v2601_v3, 111 }
 0x44d   : > { %v960_v41 = vadd.f32 %v948_v25, %v912_v53  ;;  %v961_v5 = vadd.f32 %v949_v19, %v913_v0  ;;  %v1181_v17 = vpop.permute.xlu1 %1180  ;;  %v1045_v19 = vmul.f32 %v3286_v47, %v1009_v43  ;;  %v1046_v53 = vmul.f32 %v3286_v47, %v1010_v11 }
 0x44e   : > { %v1194_v61 = vsel %vm1182_vm10, %v1181_v17, %v1169_v62  ;;  %v1188_v30 = vsel %vm1182_vm10, %v1169_v62, %v1181_v17 }
 0x44f   : > { %v1058_v4 = vadd.f32 %v1046_v53, %v961_v5  ;;  %v1241_v57 = vmul.f32 %v3372_v59, %v1188_v30 }
 0x450   : > { %v1080_v21 = vpop.permute.xlu0 %1079 }
 0x451   : > { %v1088_v14 = vsel %vm3777_vm13, %v1068_v7, %v1080_v21  ;;  %v1094_v32 = vsel %vm3778_vm11, %v1080_v21, %v1068_v7  ;;  %v1388_v22 = vpop.permute.xlu1 %1387  ;;  %v1057_v21 = vadd.f32 %v1045_v19, %v960_v41 }
 0x452   : > { %v1106_v18 = vsel %vm2612_vm3, %v1088_v14, 0.0  ;;  %v1107_v23 = vsel %vm2703_vm0, %v1094_v32, 0.0  ;;  %v1206_v14 = vsel %vm505_vm12, %v1194_v61, 0.0 }
 0x453   : > { %v1142_v9 = vmul.f32 %v3366_v52, %v1106_v18  ;;  %v1143_v55 = vmul.f32 %v3366_v52, %v1107_v23  ;;  %v1242_v41 = vmul.f32 %v3372_v59, %v1206_v14 }
 0x454   : > { %v1082_v2 = vpop.permute.xlu0 %1081 }
 0x455   : > { %v1154_v48 = vadd.f32 %v1142_v9, %v1055_v12  ;;  %v1155_v28 = vadd.f32 %v1143_v55, %v1056_v38  ;;  %v1095_v7 = vsel %vm3782_vm15, %v1082_v2, %v1070_v46  ;;  %v1264_v40 = vpop.permute.xlu1 %1263 }
 0x456   : > { %v1109_v25 = vsel %vm2703_vm0, %v1095_v7, 0.0 }
 0x457   : > { %v1145_v45 = vmul.f32 %v3368_v60, %v1109_v25 }
 0x458   : > { %v1167_v10 = vpop.permute.xlu0 %1166 }
 0x459   : > { %v1157_v32 = vadd.f32 %v1145_v45, %v1058_v4 }
 0x45b   : > { %v1254_v29 = vadd.f32 %v1242_v41, %v1157_v32 }
 0x45c   : > { %v1179_v6 = vpop.permute.xlu0 %1178 }
 0x45d   : > { %v1187_v15 = vsel %vm1182_vm10, %v1167_v10, %v1179_v6  ;;  %v1193_v54 = vsel %vm1182_vm10, %v1179_v6, %v1167_v10 }
 0x45e   : > { %v1204_v42 = vsel %vm505_vm12, %v1193_v54, 0.0  ;;  %v1239_v26 = vmul.f32 %v3370_v27, %v1187_v15 }
 0x45f   : > { %v1240_v52 = vmul.f32 %v3370_v27, %v1204_v42  ;;  %v1089_v27 = vsel %vm3781_vm2, %v1070_v46, %v1082_v2 }
 0x460   : > { %v1251_v33 = vadd.f32 %v1239_v26, %v1154_v48  ;;  %v1383_v24 = vpop.permute.xlu0 %1382  ;;  %v1108_v51 = vsel %vm2612_vm3, %v1089_v27, 0.0  ;;  %vm3784_vm3 = vmmov %vm3783_vm9 }
 0x461   : > { %v1252_v13 = vadd.f32 %v1240_v52, %v1155_v28  ;;  %v1144_v46 = vmul.f32 %v3368_v60, %v1108_v51  ;;  %vm3785_vm0 = vmmov %vm3784_vm3 }
 0x462   : > { %vm3786_vm10 = vmmov %vm3785_vm0 }
 0x463   : > { %v1156_v16 = vadd.f32 %v1144_v46, %v1057_v21 }
 0x464   : > { %v1266_v31 = vpop.permute.xlu0 %1265 }
 0x465   : > { %v1253_v23 = vadd.f32 %v1241_v57, %v1156_v16 }
 0x468   : > { %v1278_v34 = vpop.permute.xlu0 %1277 }
 0x469   : > { %v1285_v8 = vsel %vm3783_vm9, %v1266_v31, %v1278_v34  ;;  %v1291_v20 = vsel %vm3784_vm3, %v1278_v34, %v1266_v31 }
 0x46a   : > { %v1304_v47 = vsel %vm2644_vm8, %v1285_v8, 0.0  ;;  %v1305_v60 = vsel %vm2724_vm14, %v1291_v20, 0.0 }
 0x46b   : > { %v1340_v5 = vmul.f32 %v1328_v36, %v1304_v47  ;;  %v1341_v18 = vmul.f32 %v1328_v36, %v1305_v60 }
 0x46d   : > { %v1352_v12 = vadd.f32 %v1340_v5, %v1253_v23  ;;  %v1353_v59 = vadd.f32 %v1341_v18, %v1254_v29 }
 0x46f   : > { %v1400_v48 = vadd.f32 %v1388_v22, %v1352_v12  ;;  %v1401_v3 = vadd.f32 %v1388_v22, %v1353_v59 }
 0x4bc   : > { %v1577_v0 = vpop.xlane.xlu1 %1576 }
 0x4bd   : > { %2007 = vrcp.f32 %v1577_v0 }
 0x4c1   : > { %v1580_v2 = vpop.xlane.xlu1 %1579 }
 0x4c2   : > { %2009 = vrcp.f32 %v1580_v2 }
 0x4c5   : > { %v1276_v63 = vpop.permute.xlu1 %1275 }
 0x4c6   : > { %v1284_v10 = vsel %vm3785_vm0, %v1264_v40, %v1276_v63  ;;  %v1290_v39 = vsel %vm3786_vm10, %v1276_v63, %v1264_v40  ;;  %v1680_v40 = vpop.permute.xlu0 %1679 }
 0x4c7   : > { %v1302_v9 = vsel %vm2644_vm8, %v1284_v10, 0.0  ;;  %v1303_v55 = vsel %vm2724_vm14, %v1290_v39, 0.0  ;;  %v2008_v44 = vpop.eup %2007  ;;  %vm3787_vm8 = vcmask 130048  }
 0x4c8   : > { %v1338_v6 = vmul.f32 %v3386_v35, %v1302_v9  ;;  %v1339_v38 = vmul.f32 %v3386_v35, %v1303_v55  ;;  %v1582_v50 = vmul.f32 %v2008_v44, %v3374_v58  ;;  %vm3788_vm12 = vmmov %vm3787_vm8  ;;  %v1668_v58 = vld [vmem:[%s3578_s7] sm:$0xff] }
 0x4c9   : > { %vm3789_vm14 = vmmov %vm3787_vm8  ;;  %v1675_v31 = vpop.permute.xlu1 %1674 }
 0x4ca   : > { %v1350_v15 = vadd.f32 %v1338_v6, %v1251_v33  ;;  %v1351_v54 = vadd.f32 %v1339_v38, %v1252_v13  ;;  %vm3790_vm1 = vmmov %vm3787_vm8 }
 0x4cc   : > { %v1398_v42 = vadd.f32 %v1383_v24, %v1350_v15  ;;  %v1399_v26 = vadd.f32 %v1383_v24, %v1351_v54  ;;  %v2010_v36 = vpop.eup %2009 }
 0x4cd   : > { %v1584_v35 = vmul.f32 %v2010_v36, %v3378_v56  ;;  %v1669_v56 = vld [vmem:[%s3578_s7 + $0x8] sm:$0xff] }
 0x4ce   : > { %v1877_v28 = vpack.c.bf16 %v1401_v3, %v1399_v26  ;;  %v1879_v52 = vpack.c.bf16 %v1400_v48, %v1398_v42 }
 0x4d0   : > { %1878 = vmatprep.subr.bf16.mxu1 %v1877_v28 }
 0x4d1   : > { %1880 = vmatpush1.bf16.msra.mxu1 %v1879_v52 }
 0x4d4   : > { %1858 = vmatmul.mubr.msk.f32.vlgmr.msra.gmra.mrb[4].mxu1 %vm3787_vm8, %v1582_v50 }
 0x4d5   : > { %1661 = vmatprep.mubr.f32.mxu1 %v3753_v1 }
 0x4d8   : > { %1859 = vmatmul.mubr.msk.f32.gmra.mrb[6].mxu1 %vm3788_vm12, %v1584_v35 }
 0x4d9   : > { %1752 = vmatprep.mubr.f32.mxu1 %v3753_v1 }
 0x5a7   : > { %v1657_v33 = vpop.f32.mrb[4].mxu1 }
 0x5a8   : > { %v1659_v13 = vpop.f32.mrb[5].mxu1 }
 0x5ab   : > { %v1663_v62 = vpop.f32.mrb[6].mxu1 }
 0x5ac   : > { %v1883_v17 = vpack.c.bf16 %v1663_v62, %v1657_v33  ;;  %v1665_v24 = vpop.f32.mrb[7].mxu1 }
 0x5ad   : > { %v1881_v22 = vpack.c.bf16 %v1665_v24, %v1659_v13 }
 0x5af   : > { %1882 = vmatprep.subr.bf16.mxu1 %v1881_v22 }
 0x5b0   : > { %1884 = vmatpush1.bf16.msra.mxu1 %v1883_v17 }
 0x5b3   : > { %1860 = vmatmul.mubr.msk.f32.vlgmr.msra.gmra.mrb[8].mxu1 %vm3789_vm14, %v1668_v58 }
 0x5b4   : > { %1758 = vmatprep.mubr.f32.mxu1 %v3753_v1 }
 0x5b7   : > { %1861 = vmatmul.mubr.msk.f32.gmra.mrb[10].mxu1 %vm3790_vm1, %v1669_v56 }
 0x686   : > { %v1754_v49 = vpop.f32.mrb[8].mxu1 }
 0x687   : > { %v1755_v37 = vadd.f32 %v1754_v49, %v1675_v31  ;;  %v1756_v27 = vpop.f32.mrb[9].mxu1 }
 0x688   : > { %v1757_v7 = vadd.f32 %v1756_v27, %v1675_v31 }
 0x689   : > { %1765 = vst [vmem:[%s325_s28] sm:$0xff] %v1755_v37 }
 0x68a   : > { %1766 = vst [vmem:[%s325_s28 + $0x8] sm:$0xff] %v1757_v7  ;;  %v1760_v1 = vpop.f32.mrb[10].mxu1 }
 0x68b   : > { %v1761_v43 = vadd.f32 %v1760_v1, %v1680_v40  ;;  %v1762_v11 = vpop.f32.mrb[11].mxu1 }
 0x68c   : > { %v1763_v51 = vadd.f32 %v1762_v11, %v1680_v40 }
 0x68d   : > { %1767 = vst [vmem:[%s325_s28 + $0x10] sm:$0xff] %v1761_v43 }
 0x68e   : > { %1768 = vst [vmem:[%s325_s28 + $0x18] sm:$0xff] %v1763_v51 }
 0x68f   : > { %2024 = shalt.err (!%p2021_p3)
}
 0x690   : > { %s2025_s22 = scalar_lea.hbm %s3527_s24, 512  ;;  %s2029_s17 = scalar_lea.hbm %s3580_s9, 1024 }
 0x691   : > { %p2026_p4 = scmp.ne.s32.totalorder %s3527_s24, %s2025_s22  ;;  %p2030_p9 = scmp.lt.u32.totalorder %s3527_s24, %s3580_s9 }
 0x692   : > { %p2031_p10 = scmp.lt.u32.totalorder %s2029_s17, %s2025_s22  ;;  %p2033_p12 = scmp.lt.u32.totalorder %s2025_s22, %s3527_s24 }
 0x693   : > { %p2027_p7 = pnand %p2026_p4, %p2183_p5 }
 0x694   : > { %p2032_p11 = por %p2031_p10, %p2030_p9 }
 0x695   : > { %p2028_p8 = pneg %p2027_p7 }
 0x696   : > { %p2034_p13 = por %p2033_p12, %p2032_p11 }
 0x698   : > { %p2035_p0 = pnand %p2034_p13, %p2028_p8 }
 0x69a   : > { %2038 = shalt.err (!%p2035_p0)
}
 0x69b   : > { %s2094_s13 = smov 256  }
 0x69c   : > { %1885 = dma.vmem_to_hbm [thread:$0]  (%p2183_p5), %s3522_s29, 512, %s3527_s24, %s3529_s25, %s2094_s13, %s2094_s13, %s2088_s16  }
 0x69d PF: > { %p1891_p1 = scmp.ge.s32.totalorder %s2073_s12, 2  ;;  %s1798_s27 = sand.u32 1, %s2061_s30  }
 0x69e   : > { %s1799_s23 = scalar_lea.sflag [#allocation3], %s1798_s27 }
 0x69f   : > { %p1888_p2 = pnand %p1891_p1, %p2187_p6 }
 0x6a1   : > { %2056 = dma.done.wait (!%p1888_p2), %s1799_s23, 512  }
 0x6a2   : > { %2058 = vsyncadd (!%p1888_p2), %s1799_s23, 4294966784  ;;  %p19_p3 = scmp.ge.s32.totalorder %s2170_s15, 4   ;;  %s3791_s30 = smov %s2065_s10 }
 0x6a3   : > { %s3792_s10 = smov %s2069_s11  ;;  %s3793_s11 = smov %s2181_s18 }
 0x6a4   : > { %s3794_s12 = smov %s2170_s15  ;;  %21 = sbr.rel (!%p19_p3) target bundleno = 3 (0x3), region = 91 }
 0x6ab   :  { %1804 = vsyncpa [#allocation3], 1 }
 0x6ac   :  { %1806 = vsyncpa [#allocation3 + $0x1], 1 }

</bundles_post_ra>
